<compile_context>
chip_gen: v5e
topology: v5e:2x2
jax: 0.10.0
libtpu: 0.0.40
codegen_flags: <defaults>
</compile_context>

<pallas_src>
import functools

import jax
import jax.numpy as jnp
from jax.experimental import pallas as pl
from jax.experimental.pallas import tpu as pltpu


def _mha_kernel(xq_ref, xk_ref, xv_ref, wq_ref, wk_ref, wv_ref, wo_ref, bo_ref,
                o_ref, *, num_heads, dim_per_head):
    Bb, Tm, E = xq_ref.shape
    _, N, _ = xk_ref.shape
    Ep = o_ref.shape[-1]
    H, F = num_heads, dim_per_head

    # Fused projections: one (Bb*rows, E) matmul per input so the MXU sees many
    # rows. bf16 operands, f32 accumulation. 1/sqrt(F) is pre-folded into Wq.
    xq2 = xq_ref[...].reshape(Bb * Tm, E).astype(jnp.bfloat16)
    xk2 = xk_ref[...].reshape(Bb * N, E).astype(jnp.bfloat16)
    xv2 = xv_ref[...].reshape(Bb * N, E).astype(jnp.bfloat16)

    q3 = jnp.dot(xq2, wq_ref[...],
                 preferred_element_type=jnp.float32).astype(jnp.bfloat16).reshape(Bb, Tm, E)
    k3 = jnp.dot(xk2, wk_ref[...],
                 preferred_element_type=jnp.float32).astype(jnp.bfloat16).reshape(Bb, N, E)
    v3 = jnp.dot(xv2, wv_ref[...],
                 preferred_element_type=jnp.float32).astype(jnp.bfloat16).reshape(Bb, N, E)

    # Per-head attention with the output projection accumulated inside the head
    # loop: no concatenate of head outputs is ever materialized.  Wo is (H, F, Ep)
    # so wo_ref[h] is a clean leading-dim load (no lane slicing of the weight).
    acc = jnp.zeros((Bb * Tm, Ep), jnp.float32)
    for h in range(H):
        lo = h * F
        qh = q3[:, :, lo:lo + F]                           # (Bb, Tm, F) bf16
        kh = k3[:, :, lo:lo + F]                           # (Bb, N,  F) bf16
        vh = v3[:, :, lo:lo + F]                           # (Bb, N,  F) bf16

        s = jnp.einsum('bmf,bnf->bmn', qh, kh,
                       preferred_element_type=jnp.float32)  # (Bb, Tm, N) f32
        m = jnp.max(s, axis=-1, keepdims=True)
        e = jnp.exp(s - m)
        denom = jnp.sum(e, axis=-1, keepdims=True)
        attn = (e * pl.reciprocal(denom, approx=True)).astype(jnp.bfloat16)

        oh = jnp.einsum('bmn,bnf->bmf', attn, vh,
                        preferred_element_type=jnp.float32)  # (Bb, Tm, F) f32
        acc = acc + jnp.dot(oh.reshape(Bb * Tm, F).astype(jnp.bfloat16),
                            wo_ref[h], preferred_element_type=jnp.float32)

    o = acc + bo_ref[...]                                   # (Bb*Tm, Ep) + (1, Ep)
    o_ref[...] = o.reshape(Bb, Tm, Ep).astype(o_ref.dtype)


def _tpu_defaults():
    """(vmem_capacity_bytes, target fused MXU rows), generation-aware."""
    vmem_cap = 64 * 1024 * 1024          # conservative (v7x-sized) fallback
    target_rows = 256
    try:
        vmem_cap = int(pltpu.get_tpu_info().vmem_capacity_bytes)
    except Exception:
        pass
    try:
        kind = jax.devices()[0].device_kind.lower()
        if "v5e" in kind or "v5 lite" in kind or "v5lite" in kind:
            target_rows = 128            # 4x(128x128) MXUs saturate with 128 rows
        elif "v6" in kind or "v7" in kind:
            target_rows = 512            # 256-wide MXU: more rows per push
    except Exception:
        pass
    return vmem_cap, target_rows


def _choose_m_tile(M, cap=256):
    """Largest divisor of M <= cap, preferring a multiple of 8 (sublane-aligned)."""
    divs = [d for d in range(1, M + 1) if M % d == 0 and d <= cap]
    mult8 = [d for d in divs if d % 8 == 0]
    return (mult8 or divs)[-1]


def _choose_batch_block(B, Tm, N, E, Ep, target_rows, vmem_budget_bytes):
    """Largest divisor of B whose fused block fits the VMEM budget; stop growing
    once the fused row count reaches ~target_rows."""
    def est_bytes(bb):
        f4, b2 = 4, 2
        rq, rkv = bb * Tm, bb * N
        byt = 0
        byt += 2 * bb * Tm * E * f4              # xq block, double buffered (f32 in HBM)
        byt += 2 * 2 * bb * N * E * f4           # xk / xv blocks, double buffered
        byt += 2 * bb * Tm * Ep * f4             # output block, double buffered
        byt += (rq + 2 * rkv) * E * (f4 + b2)    # q/k/v f32 results + bf16 copies
        byt += (rq + 2 * rkv) * E * b2           # bf16 casts of the inputs
        byt += 2 * bb * Tm * N * f4              # one head's scores + exp (transient)
        byt += bb * Tm * Ep * f4                 # f32 output accumulator
        byt += (2 * 3 * E * E + 2 * E * Ep) * b2  # weights (worst case: double buffered)
        return byt

    best = 1
    for bb in range(1, B + 1):
        if B % bb:
            continue
        if bb > 1 and est_bytes(bb) > vmem_budget_bytes:
            break
        best = bb
        if bb * Tm >= target_rows:
            break
    return best


def multi_head_attention(xq, xk, xv, wq, wk, wv, wo, bo, num_heads):
    """xq: (B, M, E), xk/xv: (B, N, E).  Weights in PyTorch (out, in) layout:
    wq/wk/wv/wo: (E, E); bo: (E,).  Returns (B, M, E) in xq.dtype."""
    B, M, E = xq.shape
    _, N, _ = xk.shape
    assert xk.shape == (B, N, E) and xv.shape == (B, N, E)
    assert E % num_heads == 0
    H = num_heads
    F = E // H
    scaling = float(F) ** -0.5

    # PyTorch (out, in) -> (in, out); fold 1/sqrt(F) into Wq once; bf16 MXU feed.
    wq_t = (wq.T * scaling).astype(jnp.bfloat16)
    wk_t = wk.T.astype(jnp.bfloat16)
    wv_t = wv.T.astype(jnp.bfloat16)

    # Lane-dense output projection: pad out-dim up to a multiple of 128.  When
    # E is already a multiple of 128 there is no padding and no wrapper slice.
    Ep = ((E + 127) // 128) * 128
    wo_t = wo.T if Ep == E else jnp.pad(wo.T, ((0, 0), (0, Ep - E)))
    wo_h = wo_t.reshape(H, F, Ep).astype(jnp.bfloat16)     # per-head Wo
    bo_p = (bo if Ep == E else jnp.pad(bo, (0, Ep - E))).reshape(1, Ep).astype(jnp.float32)

    vmem_cap, target_rows = _tpu_defaults()
    Tm = _choose_m_tile(M)
    Bb = _choose_batch_block(B, Tm, N, E, Ep, target_rows,
                             vmem_budget_bytes=int(vmem_cap * 0.4))
    grid = (B // Bb, M // Tm)

    kernel = functools.partial(_mha_kernel, num_heads=H, dim_per_head=F)
    vmem_limit = min(int(vmem_cap * 0.75), 96 * 1024 * 1024)

    def build(single_buffer_weights):
        if single_buffer_weights:
            # Grid-invariant weights: single-buffered to halve their VMEM cost.
            def wspec(shape):
                return pl.BlockSpec(shape, lambda b, m: (0,) * len(shape),
                                    pipeline_mode=pl.Buffered(1))
        else:
            def wspec(shape):
                return pl.BlockSpec(shape, lambda b, m: (0,) * len(shape))
        return pl.pallas_call(
            kernel,
            out_shape=jax.ShapeDtypeStruct((B, M, Ep), xq.dtype),
            grid_spec=pltpu.PrefetchScalarGridSpec(
                num_scalar_prefetch=0,
                grid=grid,
                in_specs=[
                    pl.BlockSpec((Bb, Tm, E), lambda b, m: (b, m, 0)),   # xq
                    pl.BlockSpec((Bb, N, E), lambda b, m: (b, 0, 0)),    # xk
                    pl.BlockSpec((Bb, N, E), lambda b, m: (b, 0, 0)),    # xv
                    wspec((E, E)),        # Wq^T * scaling (bf16)
                    wspec((E, E)),        # Wk^T (bf16)
                    wspec((E, E)),        # Wv^T (bf16)
                    wspec((H, F, Ep)),    # Wo per head (bf16, lane-padded)
                    wspec((1, Ep)),       # bo (f32, lane-padded)
                ],
                out_specs=pl.BlockSpec((Bb, Tm, Ep), lambda b, m: (b, m, 0)),
            ),
            compiler_params=pltpu.CompilerParams(
                dimension_semantics=("parallel", "parallel"),
                vmem_limit_bytes=vmem_limit),
        )

    args = (xq, xk, xv, wq_t, wk_t, wv_t, wo_h, bo_p)
    try:
        out_padded = build(single_buffer_weights=True)(*args)
    except Exception:
        # Fallback if this Pallas version rejects pl.Buffered(1) on inputs.
        out_padded = build(single_buffer_weights=False)(*args)

    return out_padded if Ep == E else out_padded[..., :E]


def multi_head_attention_ref(xq, xk, xv, wq, wk, wv, wo, bo, num_heads):
    """Pure-JAX f32 reference matching the PyTorch forward (einsum form)."""
    B, M, E = xq.shape
    N = xk.shape[1]
    F = E // num_heads
    scaling = 1.0 / jnp.sqrt(jnp.float32(F))
    q = (xq @ wq.T).reshape(B, M, num_heads, F)
    k = (xk @ wk.T).reshape(B, N, num_heads, F)
    v = (xv @ wv.T).reshape(B, N, num_heads, F)
    dot = scaling * jnp.einsum('bmhf,bnhf->bhmn', q, k)
    attn = jax.nn.softmax(dot, axis=-1)
    out = jnp.einsum('bhmn,bnhf->bmhf', attn, v)
    wo_hf = wo.reshape(E, num_heads, F)
    return jnp.einsum('bmhf,ehf->bme', out, wo_hf) + bo


if __name__ == "__main__":
    B, S, E, H = 2, 8, 32, 4

    key = jax.random.PRNGKey(0)
    kq_in, kk_in, kv_in, kwq, kwk, kwv, kwo, kbo = jax.random.split(key, 8)

    # PyTorch Linear default init: U(-1/sqrt(in), 1/sqrt(in)).
    bound = 1.0 / jnp.sqrt(jnp.float32(E))
    xq = jax.random.normal(kq_in, (B, S, E), dtype=jnp.float32)
    xk = jax.random.normal(kk_in, (B, S, E), dtype=jnp.float32)
    xv = jax.random.normal(kv_in, (B, S, E), dtype=jnp.float32)
    wq = jax.random.uniform(kwq, (E, E), jnp.float32, -bound, bound)
    wk = jax.random.uniform(kwk, (E, E), jnp.float32, -bound, bound)
    wv = jax.random.uniform(kwv, (E, E), jnp.float32, -bound, bound)
    wo = jax.random.uniform(kwo, (E, E), jnp.float32, -bound, bound)
    bo = jax.random.uniform(kbo, (E,), jnp.float32, -bound, bound)

    out = multi_head_attention(xq, xk, xv, wq, wk, wv, wo, bo, H)
    out = jax.block_until_ready(out)

    ref = multi_head_attention_ref(xq, xk, xv, wq, wk, wv, wo, bo, H)
    assert out.shape == (B, S, E)
    # bf16 MXU feed + approx softmax reciprocal vs f32 reference: ~1e-2 tolerance.
    assert jnp.allclose(out, ref, atol=2e-2, rtol=2e-2), "mismatch vs reference"

    print("KERNEL_OK")
</pallas_src>

<mosaic_0001>
module attributes {stable_mosaic.version = 11 : i64} {
  func.func @_mha_kernel(%arg0: i32, %arg1: i32, %arg2: memref<2x8x32xf32, #tpu.memory_space<vmem>>, %arg3: memref<2x8x32xf32, #tpu.memory_space<vmem>>, %arg4: memref<2x8x32xf32, #tpu.memory_space<vmem>>, %arg5: memref<32x32xbf16, #tpu.memory_space<vmem>>, %arg6: memref<32x32xbf16, #tpu.memory_space<vmem>>, %arg7: memref<32x32xbf16, #tpu.memory_space<vmem>>, %arg8: memref<4x8x128xbf16, #tpu.memory_space<vmem>>, %arg9: memref<1x128xf32, #tpu.memory_space<vmem>>, %arg10: memref<2x8x128xf32, #tpu.memory_space<vmem>>) attributes {dimension_semantics = [#tpu.dimension_semantics<parallel>, #tpu.dimension_semantics<parallel>], iteration_bounds = array<i64: 1, 1>, scalar_prefetch = 0 : i64, scratch_operands = 0 : i64, tpu.core_type = #tpu.core_type<tc>, window_params = [{transform_indices = @transform_0, window_bounds = array<i64: 2, 8, 32>}, {transform_indices = @transform_1, window_bounds = array<i64: 2, 8, 32>}, {transform_indices = @transform_2, window_bounds = array<i64: 2, 8, 32>}, {pipeline_mode = #tpu.pipeline_mode<synchronous>, transform_indices = @transform_3, window_bounds = array<i64: 32, 32>}, {pipeline_mode = #tpu.pipeline_mode<synchronous>, transform_indices = @transform_4, window_bounds = array<i64: 32, 32>}, {pipeline_mode = #tpu.pipeline_mode<synchronous>, transform_indices = @transform_5, window_bounds = array<i64: 32, 32>}, {pipeline_mode = #tpu.pipeline_mode<synchronous>, transform_indices = @transform_6, window_bounds = array<i64: 4, 8, 128>}, {pipeline_mode = #tpu.pipeline_mode<synchronous>, transform_indices = @transform_7, window_bounds = array<i64: 1, 128>}, {transform_indices = @transform_8, window_bounds = array<i64: 2, 8, 128>}]} {
    %c0 = arith.constant 0 : index
    %c0_0 = arith.constant 0 : index
    %c0_1 = arith.constant 0 : index
    %0 = vector.load %arg2[%c0, %c0_0, %c0_1] : memref<2x8x32xf32, #tpu.memory_space<vmem>>, vector<2x8x32xf32>
    %1 = vector.shape_cast %0 : vector<2x8x32xf32> to vector<16x32xf32>
    %2 = arith.truncf %1 : vector<16x32xf32> to vector<16x32xbf16>
    %c0_2 = arith.constant 0 : index
    %c0_3 = arith.constant 0 : index
    %c0_4 = arith.constant 0 : index
    %3 = vector.load %arg3[%c0_2, %c0_3, %c0_4] : memref<2x8x32xf32, #tpu.memory_space<vmem>>, vector<2x8x32xf32>
    %4 = vector.shape_cast %3 : vector<2x8x32xf32> to vector<16x32xf32>
    %5 = arith.truncf %4 : vector<16x32xf32> to vector<16x32xbf16>
    %c0_5 = arith.constant 0 : index
    %c0_6 = arith.constant 0 : index
    %c0_7 = arith.constant 0 : index
    %6 = vector.load %arg4[%c0_5, %c0_6, %c0_7] : memref<2x8x32xf32, #tpu.memory_space<vmem>>, vector<2x8x32xf32>
    %7 = vector.shape_cast %6 : vector<2x8x32xf32> to vector<16x32xf32>
    %8 = arith.truncf %7 : vector<16x32xf32> to vector<16x32xbf16>
    %c0_8 = arith.constant 0 : index
    %c0_9 = arith.constant 0 : index
    %9 = vector.load %arg5[%c0_8, %c0_9] : memref<32x32xbf16, #tpu.memory_space<vmem>>, vector<32x32xbf16>
    %cst = arith.constant dense<0.000000e+00> : vector<16x32xf32>
    %10 = tpu.matmul %2, %9, %cst {dimension_numbers = #tpu.dot_dimension_numbers<[1], [0], [0], [1], [0, 0, 1, 1], [], []>} : vector<16x32xbf16>, vector<32x32xbf16>, vector<16x32xf32> -> vector<16x32xf32>
    %11 = arith.truncf %10 : vector<16x32xf32> to vector<16x32xbf16>
    %12 = vector.shape_cast %11 : vector<16x32xbf16> to vector<2x8x32xbf16>
    %c0_10 = arith.constant 0 : index
    %c0_11 = arith.constant 0 : index
    %13 = vector.load %arg6[%c0_10, %c0_11] : memref<32x32xbf16, #tpu.memory_space<vmem>>, vector<32x32xbf16>
    %cst_12 = arith.constant dense<0.000000e+00> : vector<16x32xf32>
    %14 = tpu.matmul %5, %13, %cst_12 {dimension_numbers = #tpu.dot_dimension_numbers<[1], [0], [0], [1], [0, 0, 1, 1], [], []>} : vector<16x32xbf16>, vector<32x32xbf16>, vector<16x32xf32> -> vector<16x32xf32>
    %15 = arith.truncf %14 : vector<16x32xf32> to vector<16x32xbf16>
    %16 = vector.shape_cast %15 : vector<16x32xbf16> to vector<2x8x32xbf16>
    %c0_13 = arith.constant 0 : index
    %c0_14 = arith.constant 0 : index
    %17 = vector.load %arg7[%c0_13, %c0_14] : memref<32x32xbf16, #tpu.memory_space<vmem>>, vector<32x32xbf16>
    %cst_15 = arith.constant dense<0.000000e+00> : vector<16x32xf32>
    %18 = tpu.matmul %8, %17, %cst_15 {dimension_numbers = #tpu.dot_dimension_numbers<[1], [0], [0], [1], [0, 0, 1, 1], [], []>} : vector<16x32xbf16>, vector<32x32xbf16>, vector<16x32xf32> -> vector<16x32xf32>
    %19 = arith.truncf %18 : vector<16x32xf32> to vector<16x32xbf16>
    %20 = vector.shape_cast %19 : vector<16x32xbf16> to vector<2x8x32xbf16>
    %cst_16 = arith.constant 0.000000e+00 : f32
    %21 = vector.broadcast %cst_16 : f32 to vector<16x128xf32>
    %22 = vector.extract_strided_slice %12 {offsets = [0, 0, 0], sizes = [2, 8, 8], strides = [1, 1, 1]} : vector<2x8x32xbf16> to vector<2x8x8xbf16>
    %23 = vector.extract_strided_slice %16 {offsets = [0, 0, 0], sizes = [2, 8, 8], strides = [1, 1, 1]} : vector<2x8x32xbf16> to vector<2x8x8xbf16>
    %24 = vector.extract_strided_slice %20 {offsets = [0, 0, 0], sizes = [2, 8, 8], strides = [1, 1, 1]} : vector<2x8x32xbf16> to vector<2x8x8xbf16>
    "tpu.trace_start"() <{level = 10 : i32, message = "bmf,bnf->bmn"}> : () -> ()
    %cst_17 = arith.constant dense<0.000000e+00> : vector<2x8x8xf32>
    %25 = tpu.matmul %22, %23, %cst_17 {dimension_numbers = #tpu.dot_dimension_numbers<[2], [2], [1], [1], [0, 0, 0, 1, 1, 1], [0], [0]>} : vector<2x8x8xbf16>, vector<2x8x8xbf16>, vector<2x8x8xf32> -> vector<2x8x8xf32>
    "tpu.trace_stop"() : () -> ()
    %cst_18 = arith.constant dense<0xFF800000> : vector<2x8xf32>
    %26 = vector.multi_reduction <maximumf>, %25, %cst_18 [2] : vector<2x8x8xf32> to vector<2x8xf32>
    %27 = vector.shape_cast %26 : vector<2x8xf32> to vector<2x8x1xf32>
    %28 = vector.broadcast %27 : vector<2x8x1xf32> to vector<2x8x8xf32>
    %29 = arith.subf %25, %28 : vector<2x8x8xf32>
    %30 = math.exp %29 : vector<2x8x8xf32>
    %cst_19 = arith.constant dense<0.000000e+00> : vector<2x8xf32>
    %31 = vector.multi_reduction <add>, %30, %cst_19 [2] : vector<2x8x8xf32> to vector<2x8xf32>
    %32 = vector.shape_cast %31 : vector<2x8xf32> to vector<2x8x1xf32>
    %33 = tpu.reciprocal %32 {approx = true} : vector<2x8x1xf32> -> vector<2x8x1xf32>
    %34 = vector.broadcast %33 : vector<2x8x1xf32> to vector<2x8x8xf32>
    %35 = arith.mulf %30, %34 : vector<2x8x8xf32>
    %36 = arith.truncf %35 : vector<2x8x8xf32> to vector<2x8x8xbf16>
    "tpu.trace_start"() <{level = 10 : i32, message = "bmn,bnf->bmf"}> : () -> ()
    %cst_20 = arith.constant dense<0.000000e+00> : vector<2x8x8xf32>
    %37 = tpu.matmul %36, %24, %cst_20 {dimension_numbers = #tpu.dot_dimension_numbers<[2], [1], [1], [2], [0, 0, 0, 1, 1, 2], [0], [0]>} : vector<2x8x8xbf16>, vector<2x8x8xbf16>, vector<2x8x8xf32> -> vector<2x8x8xf32>
    "tpu.trace_stop"() : () -> ()
    %38 = vector.shape_cast %37 : vector<2x8x8xf32> to vector<16x8xf32>
    %39 = arith.truncf %38 : vector<16x8xf32> to vector<16x8xbf16>
    %c0_21 = arith.constant 0 : index
    %c0_22 = arith.constant 0 : index
    %c0_23 = arith.constant 0 : index
    %40 = vector.load %arg8[%c0_21, %c0_22, %c0_23] : memref<4x8x128xbf16, #tpu.memory_space<vmem>>, vector<1x8x128xbf16>
    %41 = vector.shape_cast %40 : vector<1x8x128xbf16> to vector<8x128xbf16>
    %cst_24 = arith.constant dense<0.000000e+00> : vector<16x128xf32>
    %42 = tpu.matmul %39, %41, %cst_24 {dimension_numbers = #tpu.dot_dimension_numbers<[1], [0], [0], [1], [0, 0, 1, 1], [], []>} : vector<16x8xbf16>, vector<8x128xbf16>, vector<16x128xf32> -> vector<16x128xf32>
    %43 = arith.addf %21, %42 : vector<16x128xf32>
    %44 = vector.extract_strided_slice %12 {offsets = [0, 0, 8], sizes = [2, 8, 8], strides = [1, 1, 1]} : vector<2x8x32xbf16> to vector<2x8x8xbf16>
    %45 = vector.extract_strided_slice %16 {offsets = [0, 0, 8], sizes = [2, 8, 8], strides = [1, 1, 1]} : vector<2x8x32xbf16> to vector<2x8x8xbf16>
    %46 = vector.extract_strided_slice %20 {offsets = [0, 0, 8], sizes = [2, 8, 8], strides = [1, 1, 1]} : vector<2x8x32xbf16> to vector<2x8x8xbf16>
    "tpu.trace_start"() <{level = 10 : i32, message = "bmf,bnf->bmn"}> : () -> ()
    %cst_25 = arith.constant dense<0.000000e+00> : vector<2x8x8xf32>
    %47 = tpu.matmul %44, %45, %cst_25 {dimension_numbers = #tpu.dot_dimension_numbers<[2], [2], [1], [1], [0, 0, 0, 1, 1, 1], [0], [0]>} : vector<2x8x8xbf16>, vector<2x8x8xbf16>, vector<2x8x8xf32> -> vector<2x8x8xf32>
    "tpu.trace_stop"() : () -> ()
    %cst_26 = arith.constant dense<0xFF800000> : vector<2x8xf32>
    %48 = vector.multi_reduction <maximumf>, %47, %cst_26 [2] : vector<2x8x8xf32> to vector<2x8xf32>
    %49 = vector.shape_cast %48 : vector<2x8xf32> to vector<2x8x1xf32>
    %50 = vector.broadcast %49 : vector<2x8x1xf32> to vector<2x8x8xf32>
    %51 = arith.subf %47, %50 : vector<2x8x8xf32>
    %52 = math.exp %51 : vector<2x8x8xf32>
    %cst_27 = arith.constant dense<0.000000e+00> : vector<2x8xf32>
    %53 = vector.multi_reduction <add>, %52, %cst_27 [2] : vector<2x8x8xf32> to vector<2x8xf32>
    %54 = vector.shape_cast %53 : vector<2x8xf32> to vector<2x8x1xf32>
    %55 = tpu.reciprocal %54 {approx = true} : vector<2x8x1xf32> -> vector<2x8x1xf32>
    %56 = vector.broadcast %55 : vector<2x8x1xf32> to vector<2x8x8xf32>
    %57 = arith.mulf %52, %56 : vector<2x8x8xf32>
    %58 = arith.truncf %57 : vector<2x8x8xf32> to vector<2x8x8xbf16>
    "tpu.trace_start"() <{level = 10 : i32, message = "bmn,bnf->bmf"}> : () -> ()
    %cst_28 = arith.constant dense<0.000000e+00> : vector<2x8x8xf32>
    %59 = tpu.matmul %58, %46, %cst_28 {dimension_numbers = #tpu.dot_dimension_numbers<[2], [1], [1], [2], [0, 0, 0, 1, 1, 2], [0], [0]>} : vector<2x8x8xbf16>, vector<2x8x8xbf16>, vector<2x8x8xf32> -> vector<2x8x8xf32>
    "tpu.trace_stop"() : () -> ()
    %60 = vector.shape_cast %59 : vector<2x8x8xf32> to vector<16x8xf32>
    %61 = arith.truncf %60 : vector<16x8xf32> to vector<16x8xbf16>
    %c1 = arith.constant 1 : index
    %c0_29 = arith.constant 0 : index
    %c0_30 = arith.constant 0 : index
    %62 = vector.load %arg8[%c1, %c0_29, %c0_30] : memref<4x8x128xbf16, #tpu.memory_space<vmem>>, vector<1x8x128xbf16>
    %63 = vector.shape_cast %62 : vector<1x8x128xbf16> to vector<8x128xbf16>
    %cst_31 = arith.constant dense<0.000000e+00> : vector<16x128xf32>
    %64 = tpu.matmul %61, %63, %cst_31 {dimension_numbers = #tpu.dot_dimension_numbers<[1], [0], [0], [1], [0, 0, 1, 1], [], []>} : vector<16x8xbf16>, vector<8x128xbf16>, vector<16x128xf32> -> vector<16x128xf32>
    %65 = arith.addf %43, %64 : vector<16x128xf32>
    %66 = vector.extract_strided_slice %12 {offsets = [0, 0, 16], sizes = [2, 8, 8], strides = [1, 1, 1]} : vector<2x8x32xbf16> to vector<2x8x8xbf16>
    %67 = vector.extract_strided_slice %16 {offsets = [0, 0, 16], sizes = [2, 8, 8], strides = [1, 1, 1]} : vector<2x8x32xbf16> to vector<2x8x8xbf16>
    %68 = vector.extract_strided_slice %20 {offsets = [0, 0, 16], sizes = [2, 8, 8], strides = [1, 1, 1]} : vector<2x8x32xbf16> to vector<2x8x8xbf16>
    "tpu.trace_start"() <{level = 10 : i32, message = "bmf,bnf->bmn"}> : () -> ()
    %cst_32 = arith.constant dense<0.000000e+00> : vector<2x8x8xf32>
    %69 = tpu.matmul %66, %67, %cst_32 {dimension_numbers = #tpu.dot_dimension_numbers<[2], [2], [1], [1], [0, 0, 0, 1, 1, 1], [0], [0]>} : vector<2x8x8xbf16>, vector<2x8x8xbf16>, vector<2x8x8xf32> -> vector<2x8x8xf32>
    "tpu.trace_stop"() : () -> ()
    %cst_33 = arith.constant dense<0xFF800000> : vector<2x8xf32>
    %70 = vector.multi_reduction <maximumf>, %69, %cst_33 [2] : vector<2x8x8xf32> to vector<2x8xf32>
    %71 = vector.shape_cast %70 : vector<2x8xf32> to vector<2x8x1xf32>
    %72 = vector.broadcast %71 : vector<2x8x1xf32> to vector<2x8x8xf32>
    %73 = arith.subf %69, %72 : vector<2x8x8xf32>
    %74 = math.exp %73 : vector<2x8x8xf32>
    %cst_34 = arith.constant dense<0.000000e+00> : vector<2x8xf32>
    %75 = vector.multi_reduction <add>, %74, %cst_34 [2] : vector<2x8x8xf32> to vector<2x8xf32>
    %76 = vector.shape_cast %75 : vector<2x8xf32> to vector<2x8x1xf32>
    %77 = tpu.reciprocal %76 {approx = true} : vector<2x8x1xf32> -> vector<2x8x1xf32>
    %78 = vector.broadcast %77 : vector<2x8x1xf32> to vector<2x8x8xf32>
    %79 = arith.mulf %74, %78 : vector<2x8x8xf32>
    %80 = arith.truncf %79 : vector<2x8x8xf32> to vector<2x8x8xbf16>
    "tpu.trace_start"() <{level = 10 : i32, message = "bmn,bnf->bmf"}> : () -> ()
    %cst_35 = arith.constant dense<0.000000e+00> : vector<2x8x8xf32>
    %81 = tpu.matmul %80, %68, %cst_35 {dimension_numbers = #tpu.dot_dimension_numbers<[2], [1], [1], [2], [0, 0, 0, 1, 1, 2], [0], [0]>} : vector<2x8x8xbf16>, vector<2x8x8xbf16>, vector<2x8x8xf32> -> vector<2x8x8xf32>
    "tpu.trace_stop"() : () -> ()
    %82 = vector.shape_cast %81 : vector<2x8x8xf32> to vector<16x8xf32>
    %83 = arith.truncf %82 : vector<16x8xf32> to vector<16x8xbf16>
    %c2 = arith.constant 2 : index
    %c0_36 = arith.constant 0 : index
    %c0_37 = arith.constant 0 : index
    %84 = vector.load %arg8[%c2, %c0_36, %c0_37] : memref<4x8x128xbf16, #tpu.memory_space<vmem>>, vector<1x8x128xbf16>
    %85 = vector.shape_cast %84 : vector<1x8x128xbf16> to vector<8x128xbf16>
    %cst_38 = arith.constant dense<0.000000e+00> : vector<16x128xf32>
    %86 = tpu.matmul %83, %85, %cst_38 {dimension_numbers = #tpu.dot_dimension_numbers<[1], [0], [0], [1], [0, 0, 1, 1], [], []>} : vector<16x8xbf16>, vector<8x128xbf16>, vector<16x128xf32> -> vector<16x128xf32>
    %87 = arith.addf %65, %86 : vector<16x128xf32>
    %88 = vector.extract_strided_slice %12 {offsets = [0, 0, 24], sizes = [2, 8, 8], strides = [1, 1, 1]} : vector<2x8x32xbf16> to vector<2x8x8xbf16>
    %89 = vector.extract_strided_slice %16 {offsets = [0, 0, 24], sizes = [2, 8, 8], strides = [1, 1, 1]} : vector<2x8x32xbf16> to vector<2x8x8xbf16>
    %90 = vector.extract_strided_slice %20 {offsets = [0, 0, 24], sizes = [2, 8, 8], strides = [1, 1, 1]} : vector<2x8x32xbf16> to vector<2x8x8xbf16>
    "tpu.trace_start"() <{level = 10 : i32, message = "bmf,bnf->bmn"}> : () -> ()
    %cst_39 = arith.constant dense<0.000000e+00> : vector<2x8x8xf32>
    %91 = tpu.matmul %88, %89, %cst_39 {dimension_numbers = #tpu.dot_dimension_numbers<[2], [2], [1], [1], [0, 0, 0, 1, 1, 1], [0], [0]>} : vector<2x8x8xbf16>, vector<2x8x8xbf16>, vector<2x8x8xf32> -> vector<2x8x8xf32>
    "tpu.trace_stop"() : () -> ()
    %cst_40 = arith.constant dense<0xFF800000> : vector<2x8xf32>
    %92 = vector.multi_reduction <maximumf>, %91, %cst_40 [2] : vector<2x8x8xf32> to vector<2x8xf32>
    %93 = vector.shape_cast %92 : vector<2x8xf32> to vector<2x8x1xf32>
    %94 = vector.broadcast %93 : vector<2x8x1xf32> to vector<2x8x8xf32>
    %95 = arith.subf %91, %94 : vector<2x8x8xf32>
    %96 = math.exp %95 : vector<2x8x8xf32>
    %cst_41 = arith.constant dense<0.000000e+00> : vector<2x8xf32>
    %97 = vector.multi_reduction <add>, %96, %cst_41 [2] : vector<2x8x8xf32> to vector<2x8xf32>
    %98 = vector.shape_cast %97 : vector<2x8xf32> to vector<2x8x1xf32>
    %99 = tpu.reciprocal %98 {approx = true} : vector<2x8x1xf32> -> vector<2x8x1xf32>
    %100 = vector.broadcast %99 : vector<2x8x1xf32> to vector<2x8x8xf32>
    %101 = arith.mulf %96, %100 : vector<2x8x8xf32>
    %102 = arith.truncf %101 : vector<2x8x8xf32> to vector<2x8x8xbf16>
    "tpu.trace_start"() <{level = 10 : i32, message = "bmn,bnf->bmf"}> : () -> ()
    %cst_42 = arith.constant dense<0.000000e+00> : vector<2x8x8xf32>
    %103 = tpu.matmul %102, %90, %cst_42 {dimension_numbers = #tpu.dot_dimension_numbers<[2], [1], [1], [2], [0, 0, 0, 1, 1, 2], [0], [0]>} : vector<2x8x8xbf16>, vector<2x8x8xbf16>, vector<2x8x8xf32> -> vector<2x8x8xf32>
    "tpu.trace_stop"() : () -> ()
    %104 = vector.shape_cast %103 : vector<2x8x8xf32> to vector<16x8xf32>
    %105 = arith.truncf %104 : vector<16x8xf32> to vector<16x8xbf16>
    %c3 = arith.constant 3 : index
    %c0_43 = arith.constant 0 : index
    %c0_44 = arith.constant 0 : index
    %106 = vector.load %arg8[%c3, %c0_43, %c0_44] : memref<4x8x128xbf16, #tpu.memory_space<vmem>>, vector<1x8x128xbf16>
    %107 = vector.shape_cast %106 : vector<1x8x128xbf16> to vector<8x128xbf16>
    %cst_45 = arith.constant dense<0.000000e+00> : vector<16x128xf32>
    %108 = tpu.matmul %105, %107, %cst_45 {dimension_numbers = #tpu.dot_dimension_numbers<[1], [0], [0], [1], [0, 0, 1, 1], [], []>} : vector<16x8xbf16>, vector<8x128xbf16>, vector<16x128xf32> -> vector<16x128xf32>
    %109 = arith.addf %87, %108 : vector<16x128xf32>
    %c0_46 = arith.constant 0 : index
    %c0_47 = arith.constant 0 : index
    %110 = vector.load %arg9[%c0_46, %c0_47] : memref<1x128xf32, #tpu.memory_space<vmem>>, vector<1x128xf32>
    %111 = vector.broadcast %110 : vector<1x128xf32> to vector<16x128xf32>
    %112 = arith.addf %109, %111 : vector<16x128xf32>
    %113 = vector.shape_cast %112 : vector<16x128xf32> to vector<2x8x128xf32>
    %c0_48 = arith.constant 0 : index
    %c0_49 = arith.constant 0 : index
    %c0_50 = arith.constant 0 : index
    %114 = vector.load %arg10[%c0_48, %c0_49, %c0_50] : memref<2x8x128xf32, #tpu.memory_space<vmem>>, vector<2x8x128xf32>
    tpu.vector_store %arg10[%c0_48, %c0_49, %c0_50], %113 {strides = array<i32>} : memref<2x8x128xf32, #tpu.memory_space<vmem>>, vector<2x8x128xf32>,
    return
  }
  func.func @transform_0(%arg0: i32, %arg1: i32) -> (i32, i32, i32) {
    %c0_i32 = arith.constant 0 : i32
    %c0_i32_0 = arith.constant 0 : i32
    return %arg0, %arg1, %c0_i32 : i32, i32, i32
  }
  func.func @transform_1(%arg0: i32, %arg1: i32) -> (i32, i32, i32) {
    %c0_i32 = arith.constant 0 : i32
    %c0_i32_0 = arith.constant 0 : i32
    %c0_i32_1 = arith.constant 0 : i32
    return %arg0, %c0_i32, %c0_i32_0 : i32, i32, i32
  }
  func.func @transform_2(%arg0: i32, %arg1: i32) -> (i32, i32, i32) {
    %c0_i32 = arith.constant 0 : i32
    %c0_i32_0 = arith.constant 0 : i32
    %c0_i32_1 = arith.constant 0 : i32
    return %arg0, %c0_i32, %c0_i32_0 : i32, i32, i32
  }
  func.func @transform_3(%arg0: i32, %arg1: i32) -> (i32, i32) {
    %c0_i32 = arith.constant 0 : i32
    %c0_i32_0 = arith.constant 0 : i32
    %c0_i32_1 = arith.constant 0 : i32
    return %c0_i32, %c0_i32_0 : i32, i32
  }
  func.func @transform_4(%arg0: i32, %arg1: i32) -> (i32, i32) {
    %c0_i32 = arith.constant 0 : i32
    %c0_i32_0 = arith.constant 0 : i32
    %c0_i32_1 = arith.constant 0 : i32
    return %c0_i32, %c0_i32_0 : i32, i32
  }
  func.func @transform_5(%arg0: i32, %arg1: i32) -> (i32, i32) {
    %c0_i32 = arith.constant 0 : i32
    %c0_i32_0 = arith.constant 0 : i32
    %c0_i32_1 = arith.constant 0 : i32
    return %c0_i32, %c0_i32_0 : i32, i32
  }
  func.func @transform_6(%arg0: i32, %arg1: i32) -> (i32, i32, i32) {
    %c0_i32 = arith.constant 0 : i32
    %c0_i32_0 = arith.constant 0 : i32
    %c0_i32_1 = arith.constant 0 : i32
    %c0_i32_2 = arith.constant 0 : i32
    return %c0_i32, %c0_i32_0, %c0_i32_1 : i32, i32, i32
  }
  func.func @transform_7(%arg0: i32, %arg1: i32) -> (i32, i32) {
    %c0_i32 = arith.constant 0 : i32
    %c0_i32_0 = arith.constant 0 : i32
    %c0_i32_1 = arith.constant 0 : i32
    return %c0_i32, %c0_i32_0 : i32, i32
  }
  func.func @transform_8(%arg0: i32, %arg1: i32) -> (i32, i32, i32) {
    %c0_i32 = arith.constant 0 : i32
    %c0_i32_0 = arith.constant 0 : i32
    return %arg0, %arg1, %c0_i32 : i32, i32, i32
  }
}

module attributes {stable_mosaic.version = 11 : i64} {
  func.func @_mha_kernel(%arg0: i32, %arg1: i32, %arg2: memref<2x8x32xf32, #tpu.memory_space<vmem>>, %arg3: memref<2x8x32xf32, #tpu.memory_space<vmem>>, %arg4: memref<2x8x32xf32, #tpu.memory_space<vmem>>, %arg5: memref<32x32xbf16, #tpu.memory_space<vmem>>, %arg6: memref<32x32xbf16, #tpu.memory_space<vmem>>, %arg7: memref<32x32xbf16, #tpu.memory_space<vmem>>, %arg8: memref<4x8x128xbf16, #tpu.memory_space<vmem>>, %arg9: memref<1x128xf32, #tpu.memory_space<vmem>>, %arg10: memref<2x8x128xf32, #tpu.memory_space<vmem>>) attributes {dimension_semantics = [#tpu.dimension_semantics<parallel>, #tpu.dimension_semantics<parallel>], iteration_bounds = array<i64: 1, 1>, scalar_prefetch = 0 : i64, scratch_operands = 0 : i64, tpu.core_type = #tpu.core_type<tc>, window_params = [{transform_indices = @transform_0, window_bounds = array<i64: 2, 8, 32>}, {transform_indices = @transform_1, window_bounds = array<i64: 2, 8, 32>}, {transform_indices = @transform_2, window_bounds = array<i64: 2, 8, 32>}, {pipeline_mode = #tpu.pipeline_mode<synchronous>, transform_indices = @transform_3, window_bounds = array<i64: 32, 32>}, {pipeline_mode = #tpu.pipeline_mode<synchronous>, transform_indices = @transform_4, window_bounds = array<i64: 32, 32>}, {pipeline_mode = #tpu.pipeline_mode<synchronous>, transform_indices = @transform_5, window_bounds = array<i64: 32, 32>}, {pipeline_mode = #tpu.pipeline_mode<synchronous>, transform_indices = @transform_6, window_bounds = array<i64: 4, 8, 128>}, {pipeline_mode = #tpu.pipeline_mode<synchronous>, transform_indices = @transform_7, window_bounds = array<i64: 1, 128>}, {transform_indices = @transform_8, window_bounds = array<i64: 2, 8, 128>}]} {
    %c0 = arith.constant 0 : index
    %c0_0 = arith.constant 0 : index
    %c0_1 = arith.constant 0 : index
    %0 = vector.load %arg2[%c0, %c0_0, %c0_1] : memref<2x8x32xf32, #tpu.memory_space<vmem>>, vector<2x8x32xf32>
    %1 = vector.shape_cast %0 : vector<2x8x32xf32> to vector<16x32xf32>
    %2 = arith.truncf %1 : vector<16x32xf32> to vector<16x32xbf16>
    %c0_2 = arith.constant 0 : index
    %c0_3 = arith.constant 0 : index
    %c0_4 = arith.constant 0 : index
    %3 = vector.load %arg3[%c0_2, %c0_3, %c0_4] : memref<2x8x32xf32, #tpu.memory_space<vmem>>, vector<2x8x32xf32>
    %4 = vector.shape_cast %3 : vector<2x8x32xf32> to vector<16x32xf32>
    %5 = arith.truncf %4 : vector<16x32xf32> to vector<16x32xbf16>
    %c0_5 = arith.constant 0 : index
    %c0_6 = arith.constant 0 : index
    %c0_7 = arith.constant 0 : index
    %6 = vector.load %arg4[%c0_5, %c0_6, %c0_7] : memref<2x8x32xf32, #tpu.memory_space<vmem>>, vector<2x8x32xf32>
    %7 = vector.shape_cast %6 : vector<2x8x32xf32> to vector<16x32xf32>
    %8 = arith.truncf %7 : vector<16x32xf32> to vector<16x32xbf16>
    %c0_8 = arith.constant 0 : index
    %c0_9 = arith.constant 0 : index
    %9 = vector.load %arg5[%c0_8, %c0_9] : memref<32x32xbf16, #tpu.memory_space<vmem>>, vector<32x32xbf16>
    %cst = arith.constant dense<0.000000e+00> : vector<16x32xf32>
    %10 = tpu.matmul %2, %9, %cst {dimension_numbers = #tpu.dot_dimension_numbers<[1], [0], [0], [1], [0, 0, 1, 1], [], []>} : vector<16x32xbf16>, vector<32x32xbf16>, vector<16x32xf32> -> vector<16x32xf32>
    %11 = arith.truncf %10 : vector<16x32xf32> to vector<16x32xbf16>
    %12 = vector.shape_cast %11 : vector<16x32xbf16> to vector<2x8x32xbf16>
    %c0_10 = arith.constant 0 : index
    %c0_11 = arith.constant 0 : index
    %13 = vector.load %arg6[%c0_10, %c0_11] : memref<32x32xbf16, #tpu.memory_space<vmem>>, vector<32x32xbf16>
    %cst_12 = arith.constant dense<0.000000e+00> : vector<16x32xf32>
    %14 = tpu.matmul %5, %13, %cst_12 {dimension_numbers = #tpu.dot_dimension_numbers<[1], [0], [0], [1], [0, 0, 1, 1], [], []>} : vector<16x32xbf16>, vector<32x32xbf16>, vector<16x32xf32> -> vector<16x32xf32>
    %15 = arith.truncf %14 : vector<16x32xf32> to vector<16x32xbf16>
    %16 = vector.shape_cast %15 : vector<16x32xbf16> to vector<2x8x32xbf16>
    %c0_13 = arith.constant 0 : index
    %c0_14 = arith.constant 0 : index
    %17 = vector.load %arg7[%c0_13, %c0_14] : memref<32x32xbf16, #tpu.memory_space<vmem>>, vector<32x32xbf16>
    %cst_15 = arith.constant dense<0.000000e+00> : vector<16x32xf32>
    %18 = tpu.matmul %8, %17, %cst_15 {dimension_numbers = #tpu.dot_dimension_numbers<[1], [0], [0], [1], [0, 0, 1, 1], [], []>} : vector<16x32xbf16>, vector<32x32xbf16>, vector<16x32xf32> -> vector<16x32xf32>
    %19 = arith.truncf %18 : vector<16x32xf32> to vector<16x32xbf16>
    %20 = vector.shape_cast %19 : vector<16x32xbf16> to vector<2x8x32xbf16>
    %cst_16 = arith.constant 0.000000e+00 : f32
    %21 = vector.broadcast %cst_16 : f32 to vector<16x128xf32>
    %22 = vector.extract_strided_slice %12 {offsets = [0, 0, 0], sizes = [2, 8, 8], strides = [1, 1, 1]} : vector<2x8x32xbf16> to vector<2x8x8xbf16>
    %23 = vector.extract_strided_slice %16 {offsets = [0, 0, 0], sizes = [2, 8, 8], strides = [1, 1, 1]} : vector<2x8x32xbf16> to vector<2x8x8xbf16>
    %24 = vector.extract_strided_slice %20 {offsets = [0, 0, 0], sizes = [2, 8, 8], strides = [1, 1, 1]} : vector<2x8x32xbf16> to vector<2x8x8xbf16>
    "tpu.trace_start"() <{level = 10 : i32, message = "bmf,bnf->bmn"}> : () -> ()
    %cst_17 = arith.constant dense<0.000000e+00> : vector<2x8x8xf32>
    %25 = tpu.matmul %22, %23, %cst_17 {dimension_numbers = #tpu.dot_dimension_numbers<[2], [2], [1], [1], [0, 0, 0, 1, 1, 1], [0], [0]>} : vector<2x8x8xbf16>, vector<2x8x8xbf16>, vector<2x8x8xf32> -> vector<2x8x8xf32>
    "tpu.trace_stop"() : () -> ()
    %cst_18 = arith.constant dense<0xFF800000> : vector<2x8xf32>
    %26 = vector.multi_reduction <maximumf>, %25, %cst_18 [2] : vector<2x8x8xf32> to vector<2x8xf32>
    %27 = vector.shape_cast %26 : vector<2x8xf32> to vector<2x8x1xf32>
    %28 = vector.broadcast %27 : vector<2x8x1xf32> to vector<2x8x8xf32>
    %29 = arith.subf %25, %28 : vector<2x8x8xf32>
    %30 = math.exp %29 : vector<2x8x8xf32>
    %cst_19 = arith.constant dense<0.000000e+00> : vector<2x8xf32>
    %31 = vector.multi_reduction <add>, %30, %cst_19 [2] : vector<2x8x8xf32> to vector<2x8xf32>
    %32 = vector.shape_cast %31 : vector<2x8xf32> to vector<2x8x1xf32>
    %33 = tpu.reciprocal %32 {approx = true} : vector<2x8x1xf32> -> vector<2x8x1xf32>
    %34 = vector.broadcast %33 : vector<2x8x1xf32> to vector<2x8x8xf32>
    %35 = arith.mulf %30, %34 : vector<2x8x8xf32>
    %36 = arith.truncf %35 : vector<2x8x8xf32> to vector<2x8x8xbf16>
    "tpu.trace_start"() <{level = 10 : i32, message = "bmn,bnf->bmf"}> : () -> ()
    %cst_20 = arith.constant dense<0.000000e+00> : vector<2x8x8xf32>
    %37 = tpu.matmul %36, %24, %cst_20 {dimension_numbers = #tpu.dot_dimension_numbers<[2], [1], [1], [2], [0, 0, 0, 1, 1, 2], [0], [0]>} : vector<2x8x8xbf16>, vector<2x8x8xbf16>, vector<2x8x8xf32> -> vector<2x8x8xf32>
    "tpu.trace_stop"() : () -> ()
    %38 = vector.shape_cast %37 : vector<2x8x8xf32> to vector<16x8xf32>
    %39 = arith.truncf %38 : vector<16x8xf32> to vector<16x8xbf16>
    %c0_21 = arith.constant 0 : index
    %c0_22 = arith.constant 0 : index
    %c0_23 = arith.constant 0 : index
    %40 = vector.load %arg8[%c0_21, %c0_22, %c0_23] : memref<4x8x128xbf16, #tpu.memory_space<vmem>>, vector<1x8x128xbf16>
    %41 = vector.shape_cast %40 : vector<1x8x128xbf16> to vector<8x128xbf16>
    %cst_24 = arith.constant dense<0.000000e+00> : vector<16x128xf32>
    %42 = tpu.matmul %39, %41, %cst_24 {dimension_numbers = #tpu.dot_dimension_numbers<[1], [0], [0], [1], [0, 0, 1, 1], [], []>} : vector<16x8xbf16>, vector<8x128xbf16>, vector<16x128xf32> -> vector<16x128xf32>
    %43 = arith.addf %21, %42 : vector<16x128xf32>
    %44 = vector.extract_strided_slice %12 {offsets = [0, 0, 8], sizes = [2, 8, 8], strides = [1, 1, 1]} : vector<2x8x32xbf16> to vector<2x8x8xbf16>
    %45 = vector.extract_strided_slice %16 {offsets = [0, 0, 8], sizes = [2, 8, 8], strides = [1, 1, 1]} : vector<2x8x32xbf16> to vector<2x8x8xbf16>
    %46 = vector.extract_strided_slice %20 {offsets = [0, 0, 8], sizes = [2, 8, 8], strides = [1, 1, 1]} : vector<2x8x32xbf16> to vector<2x8x8xbf16>
    "tpu.trace_start"() <{level = 10 : i32, message = "bmf,bnf->bmn"}> : () -> ()
    %cst_25 = arith.constant dense<0.000000e+00> : vector<2x8x8xf32>
    %47 = tpu.matmul %44, %45, %cst_25 {dimension_numbers = #tpu.dot_dimension_numbers<[2], [2], [1], [1], [0, 0, 0, 1, 1, 1], [0], [0]>} : vector<2x8x8xbf16>, vector<2x8x8xbf16>, vector<2x8x8xf32> -> vector<2x8x8xf32>
    "tpu.trace_stop"() : () -> ()
    %cst_26 = arith.constant dense<0xFF800000> : vector<2x8xf32>
    %48 = vector.multi_reduction <maximumf>, %47, %cst_26 [2] : vector<2x8x8xf32> to vector<2x8xf32>
    %49 = vector.shape_cast %48 : vector<2x8xf32> to vector<2x8x1xf32>
    %50 = vector.broadcast %49 : vector<2x8x1xf32> to vector<2x8x8xf32>
    %51 = arith.subf %47, %50 : vector<2x8x8xf32>
    %52 = math.exp %51 : vector<2x8x8xf32>
    %cst_27 = arith.constant dense<0.000000e+00> : vector<2x8xf32>
    %53 = vector.multi_reduction <add>, %52, %cst_27 [2] : vector<2x8x8xf32> to vector<2x8xf32>
    %54 = vector.shape_cast %53 : vector<2x8xf32> to vector<2x8x1xf32>
    %55 = tpu.reciprocal %54 {approx = true} : vector<2x8x1xf32> -> vector<2x8x1xf32>
    %56 = vector.broadcast %55 : vector<2x8x1xf32> to vector<2x8x8xf32>
    %57 = arith.mulf %52, %56 : vector<2x8x8xf32>
    %58 = arith.truncf %57 : vector<2x8x8xf32> to vector<2x8x8xbf16>
    "tpu.trace_start"() <{level = 10 : i32, message = "bmn,bnf->bmf"}> : () -> ()
    %cst_28 = arith.constant dense<0.000000e+00> : vector<2x8x8xf32>
    %59 = tpu.matmul %58, %46, %cst_28 {dimension_numbers = #tpu.dot_dimension_numbers<[2], [1], [1], [2], [0, 0, 0, 1, 1, 2], [0], [0]>} : vector<2x8x8xbf16>, vector<2x8x8xbf16>, vector<2x8x8xf32> -> vector<2x8x8xf32>
    "tpu.trace_stop"() : () -> ()
    %60 = vector.shape_cast %59 : vector<2x8x8xf32> to vector<16x8xf32>
    %61 = arith.truncf %60 : vector<16x8xf32> to vector<16x8xbf16>
    %c1 = arith.constant 1 : index
    %c0_29 = arith.constant 0 : index
    %c0_30 = arith.constant 0 : index
    %62 = vector.load %arg8[%c1, %c0_29, %c0_30] : memref<4x8x128xbf16, #tpu.memory_space<vmem>>, vector<1x8x128xbf16>
    %63 = vector.shape_cast %62 : vector<1x8x128xbf16> to vector<8x128xbf16>
    %cst_31 = arith.constant dense<0.000000e+00> : vector<16x128xf32>
    %64 = tpu.matmul %61, %63, %cst_31 {dimension_numbers = #tpu.dot_dimension_numbers<[1], [0], [0], [1], [0, 0, 1, 1], [], []>} : vector<16x8xbf16>, vector<8x128xbf16>, vector<16x128xf32> -> vector<16x128xf32>
    %65 = arith.addf %43, %64 : vector<16x128xf32>
    %66 = vector.extract_strided_slice %12 {offsets = [0, 0, 16], sizes = [2, 8, 8], strides = [1, 1, 1]} : vector<2x8x32xbf16> to vector<2x8x8xbf16>
    %67 = vector.extract_strided_slice %16 {offsets = [0, 0, 16], sizes = [2, 8, 8], strides = [1, 1, 1]} : vector<2x8x32xbf16> to vector<2x8x8xbf16>
    %68 = vector.extract_strided_slice %20 {offsets = [0, 0, 16], sizes = [2, 8, 8], strides = [1, 1, 1]} : vector<2x8x32xbf16> to vector<2x8x8xbf16>
    "tpu.trace_start"() <{level = 10 : i32, message = "bmf,bnf->bmn"}> : () -> ()
    %cst_32 = arith.constant dense<0.000000e+00> : vector<2x8x8xf32>
    %69 = tpu.matmul %66, %67, %cst_32 {dimension_numbers = #tpu.dot_dimension_numbers<[2], [2], [1], [1], [0, 0, 0, 1, 1, 1], [0], [0]>} : vector<2x8x8xbf16>, vector<2x8x8xbf16>, vector<2x8x8xf32> -> vector<2x8x8xf32>
    "tpu.trace_stop"() : () -> ()
    %cst_33 = arith.constant dense<0xFF800000> : vector<2x8xf32>
    %70 = vector.multi_reduction <maximumf>, %69, %cst_33 [2] : vector<2x8x8xf32> to vector<2x8xf32>
    %71 = vector.shape_cast %70 : vector<2x8xf32> to vector<2x8x1xf32>
    %72 = vector.broadcast %71 : vector<2x8x1xf32> to vector<2x8x8xf32>
    %73 = arith.subf %69, %72 : vector<2x8x8xf32>
    %74 = math.exp %73 : vector<2x8x8xf32>
    %cst_34 = arith.constant dense<0.000000e+00> : vector<2x8xf32>
    %75 = vector.multi_reduction <add>, %74, %cst_34 [2] : vector<2x8x8xf32> to vector<2x8xf32>
    %76 = vector.shape_cast %75 : vector<2x8xf32> to vector<2x8x1xf32>
    %77 = tpu.reciprocal %76 {approx = true} : vector<2x8x1xf32> -> vector<2x8x1xf32>
    %78 = vector.broadcast %77 : vector<2x8x1xf32> to vector<2x8x8xf32>
    %79 = arith.mulf %74, %78 : vector<2x8x8xf32>
    %80 = arith.truncf %79 : vector<2x8x8xf32> to vector<2x8x8xbf16>
    "tpu.trace_start"() <{level = 10 : i32, message = "bmn,bnf->bmf"}> : () -> ()
    %cst_35 = arith.constant dense<0.000000e+00> : vector<2x8x8xf32>
    %81 = tpu.matmul %80, %68, %cst_35 {dimension_numbers = #tpu.dot_dimension_numbers<[2], [1], [1], [2], [0, 0, 0, 1, 1, 2], [0], [0]>} : vector<2x8x8xbf16>, vector<2x8x8xbf16>, vector<2x8x8xf32> -> vector<2x8x8xf32>
    "tpu.trace_stop"() : () -> ()
    %82 = vector.shape_cast %81 : vector<2x8x8xf32> to vector<16x8xf32>
    %83 = arith.truncf %82 : vector<16x8xf32> to vector<16x8xbf16>
    %c2 = arith.constant 2 : index
    %c0_36 = arith.constant 0 : index
    %c0_37 = arith.constant 0 : index
    %84 = vector.load %arg8[%c2, %c0_36, %c0_37] : memref<4x8x128xbf16, #tpu.memory_space<vmem>>, vector<1x8x128xbf16>
    %85 = vector.shape_cast %84 : vector<1x8x128xbf16> to vector<8x128xbf16>
    %cst_38 = arith.constant dense<0.000000e+00> : vector<16x128xf32>
    %86 = tpu.matmul %83, %85, %cst_38 {dimension_numbers = #tpu.dot_dimension_numbers<[1], [0], [0], [1], [0, 0, 1, 1], [], []>} : vector<16x8xbf16>, vector<8x128xbf16>, vector<16x128xf32> -> vector<16x128xf32>
    %87 = arith.addf %65, %86 : vector<16x128xf32>
    %88 = vector.extract_strided_slice %12 {offsets = [0, 0, 24], sizes = [2, 8, 8], strides = [1, 1, 1]} : vector<2x8x32xbf16> to vector<2x8x8xbf16>
    %89 = vector.extract_strided_slice %16 {offsets = [0, 0, 24], sizes = [2, 8, 8], strides = [1, 1, 1]} : vector<2x8x32xbf16> to vector<2x8x8xbf16>
    %90 = vector.extract_strided_slice %20 {offsets = [0, 0, 24], sizes = [2, 8, 8], strides = [1, 1, 1]} : vector<2x8x32xbf16> to vector<2x8x8xbf16>
    "tpu.trace_start"() <{level = 10 : i32, message = "bmf,bnf->bmn"}> : () -> ()
    %cst_39 = arith.constant dense<0.000000e+00> : vector<2x8x8xf32>
    %91 = tpu.matmul %88, %89, %cst_39 {dimension_numbers = #tpu.dot_dimension_numbers<[2], [2], [1], [1], [0, 0, 0, 1, 1, 1], [0], [0]>} : vector<2x8x8xbf16>, vector<2x8x8xbf16>, vector<2x8x8xf32> -> vector<2x8x8xf32>
    "tpu.trace_stop"() : () -> ()
    %cst_40 = arith.constant dense<0xFF800000> : vector<2x8xf32>
    %92 = vector.multi_reduction <maximumf>, %91, %cst_40 [2] : vector<2x8x8xf32> to vector<2x8xf32>
    %93 = vector.shape_cast %92 : vector<2x8xf32> to vector<2x8x1xf32>
    %94 = vector.broadcast %93 : vector<2x8x1xf32> to vector<2x8x8xf32>
    %95 = arith.subf %91, %94 : vector<2x8x8xf32>
    %96 = math.exp %95 : vector<2x8x8xf32>
    %cst_41 = arith.constant dense<0.000000e+00> : vector<2x8xf32>
    %97 = vector.multi_reduction <add>, %96, %cst_41 [2] : vector<2x8x8xf32> to vector<2x8xf32>
    %98 = vector.shape_cast %97 : vector<2x8xf32> to vector<2x8x1xf32>
    %99 = tpu.reciprocal %98 {approx = true} : vector<2x8x1xf32> -> vector<2x8x1xf32>
    %100 = vector.broadcast %99 : vector<2x8x1xf32> to vector<2x8x8xf32>
    %101 = arith.mulf %96, %100 : vector<2x8x8xf32>
    %102 = arith.truncf %101 : vector<2x8x8xf32> to vector<2x8x8xbf16>
    "tpu.trace_start"() <{level = 10 : i32, message = "bmn,bnf->bmf"}> : () -> ()
    %cst_42 = arith.constant dense<0.000000e+00> : vector<2x8x8xf32>
    %103 = tpu.matmul %102, %90, %cst_42 {dimension_numbers = #tpu.dot_dimension_numbers<[2], [1], [1], [2], [0, 0, 0, 1, 1, 2], [0], [0]>} : vector<2x8x8xbf16>, vector<2x8x8xbf16>, vector<2x8x8xf32> -> vector<2x8x8xf32>
    "tpu.trace_stop"() : () -> ()
    %104 = vector.shape_cast %103 : vector<2x8x8xf32> to vector<16x8xf32>
    %105 = arith.truncf %104 : vector<16x8xf32> to vector<16x8xbf16>
    %c3 = arith.constant 3 : index
    %c0_43 = arith.constant 0 : index
    %c0_44 = arith.constant 0 : index
    %106 = vector.load %arg8[%c3, %c0_43, %c0_44] : memref<4x8x128xbf16, #tpu.memory_space<vmem>>, vector<1x8x128xbf16>
    %107 = vector.shape_cast %106 : vector<1x8x128xbf16> to vector<8x128xbf16>
    %cst_45 = arith.constant dense<0.000000e+00> : vector<16x128xf32>
    %108 = tpu.matmul %105, %107, %cst_45 {dimension_numbers = #tpu.dot_dimension_numbers<[1], [0], [0], [1], [0, 0, 1, 1], [], []>} : vector<16x8xbf16>, vector<8x128xbf16>, vector<16x128xf32> -> vector<16x128xf32>
    %109 = arith.addf %87, %108 : vector<16x128xf32>
    %c0_46 = arith.constant 0 : index
    %c0_47 = arith.constant 0 : index
    %110 = vector.load %arg9[%c0_46, %c0_47] : memref<1x128xf32, #tpu.memory_space<vmem>>, vector<1x128xf32>
    %111 = vector.broadcast %110 : vector<1x128xf32> to vector<16x128xf32>
    %112 = arith.addf %109, %111 : vector<16x128xf32>
    %113 = vector.shape_cast %112 : vector<16x128xf32> to vector<2x8x128xf32>
    %c0_48 = arith.constant 0 : index
    %c0_49 = arith.constant 0 : index
    %c0_50 = arith.constant 0 : index
    %114 = vector.load %arg10[%c0_48, %c0_49, %c0_50] : memref<2x8x128xf32, #tpu.memory_space<vmem>>, vector<2x8x128xf32>
    tpu.vector_store %arg10[%c0_48, %c0_49, %c0_50], %113 {strides = array<i32>} : memref<2x8x128xf32, #tpu.memory_space<vmem>>, vector<2x8x128xf32>,
    return
  }
  func.func @transform_0(%arg0: i32, %arg1: i32) -> (i32, i32, i32) {
    %c0_i32 = arith.constant 0 : i32
    %c0_i32_0 = arith.constant 0 : i32
    return %arg0, %arg1, %c0_i32 : i32, i32, i32
  }
  func.func @transform_1(%arg0: i32, %arg1: i32) -> (i32, i32, i32) {
    %c0_i32 = arith.constant 0 : i32
    %c0_i32_0 = arith.constant 0 : i32
    %c0_i32_1 = arith.constant 0 : i32
    return %arg0, %c0_i32, %c0_i32_0 : i32, i32, i32
  }
  func.func @transform_2(%arg0: i32, %arg1: i32) -> (i32, i32, i32) {
    %c0_i32 = arith.constant 0 : i32
    %c0_i32_0 = arith.constant 0 : i32
    %c0_i32_1 = arith.constant 0 : i32
    return %arg0, %c0_i32, %c0_i32_0 : i32, i32, i32
  }
  func.func @transform_3(%arg0: i32, %arg1: i32) -> (i32, i32) {
    %c0_i32 = arith.constant 0 : i32
    %c0_i32_0 = arith.constant 0 : i32
    %c0_i32_1 = arith.constant 0 : i32
    return %c0_i32, %c0_i32_0 : i32, i32
  }
  func.func @transform_4(%arg0: i32, %arg1: i32) -> (i32, i32) {
    %c0_i32 = arith.constant 0 : i32
    %c0_i32_0 = arith.constant 0 : i32
    %c0_i32_1 = arith.constant 0 : i32
    return %c0_i32, %c0_i32_0 : i32, i32
  }
  func.func @transform_5(%arg0: i32, %arg1: i32) -> (i32, i32) {
    %c0_i32 = arith.constant 0 : i32
    %c0_i32_0 = arith.constant 0 : i32
    %c0_i32_1 = arith.constant 0 : i32
    return %c0_i32, %c0_i32_0 : i32, i32
  }
  func.func @transform_6(%arg0: i32, %arg1: i32) -> (i32, i32, i32) {
    %c0_i32 = arith.constant 0 : i32
    %c0_i32_0 = arith.constant 0 : i32
    %c0_i32_1 = arith.constant 0 : i32
    %c0_i32_2 = arith.constant 0 : i32
    return %c0_i32, %c0_i32_0, %c0_i32_1 : i32, i32, i32
  }
  func.func @transform_7(%arg0: i32, %arg1: i32) -> (i32, i32) {
    %c0_i32 = arith.constant 0 : i32
    %c0_i32_0 = arith.constant 0 : i32
    %c0_i32_1 = arith.constant 0 : i32
    return %c0_i32, %c0_i32_0 : i32, i32
  }
  func.func @transform_8(%arg0: i32, %arg1: i32) -> (i32, i32, i32) {
    %c0_i32 = arith.constant 0 : i32
    %c0_i32_0 = arith.constant 0 : i32
    return %arg0, %arg1, %c0_i32 : i32, i32, i32
  }
}

</mosaic_0001>

<bundles_post_ra>
// kernel: tpu_custom_call.1
= control target key start
LH: loop header
LB: loop body
LE: loop exit
PB: predicated region body
PF: predicated region fallthrough
CT: control target
= control target key end

     0   :  { %13 = vsyncpa [#allocation3], 0  ;;  %s1371_s0 = inlined_call_operand.hbm [shape: f32[2,8,32], index: 0, kind: input, shape index: {}]   ;;  %s1372_s1 = inlined_call_operand.hbm [shape: f32[2,8,32], index: 1, kind: input, shape index: {}]   ;;  %s1373_s2 = inlined_call_operand.hbm [shape: f32[2,8,32], index: 2, kind: input, shape index: {}]   ;;  %s1374_s3 = inlined_call_operand.hbm [shape: bf16[32,32], index: 3, kind: input, shape index: {}]   ;;  %s1375_s4 = inlined_call_operand.hbm [shape: bf16[32,32], index: 4, kind: input, shape index: {}]   ;;  %s1376_s5 = inlined_call_operand.hbm [shape: bf16[32,32], index: 5, kind: input, shape index: {}]   ;;  %s1377_s6 = inlined_call_operand.hbm [shape: bf16[4,8,128], index: 6, kind: input, shape index: {}]   ;;  %s1378_s7 = inlined_call_operand.vmem [shape: f32[1,128], index: 7, kind: input, shape index: {}]   ;;  %s1379_s8 = inlined_call_operand.hbm [shape: f32[2,8,128], index: 8, kind: output, shape index: {}]  }
   0x1   :  { %14 = vsyncpa [#allocation6], 0 }
   0x2   :  { %15 = vsyncpa [#allocation9], 0 }
   0x3   :  { %16 = vsyncpa [#allocation12], 0 }
   0x4   :  { %17 = vsyncpa [#allocation4], 0  ;;  %s35_s29 = sshll.u32 %s1372_s1, 4  ;;  %s1139_s30 = smov [#allocation5]   ;;  %s36_s29 = int_to_ptr.hbm [resolvable:$true] %s35_s29 }
   0x5   :  { %s37_s9 = sshll.u32 %s1139_s30, 4  ;;  %s61_s12 = sshll.u32 %s1374_s3, 4  ;;  %s38_s9 = int_to_ptr.vmem [resolvable:$true] %s37_s9  ;;  %s62_s12 = int_to_ptr.hbm [resolvable:$true] %s61_s12 }
   0x6   :  { %s1140_s13 = smov 128   ;;  %s1141_s14 = smov 8  }
   0x7   :  { %43 = dma.hbm_to_vmem [thread:$0]  %s36_s29, 256, %s38_s9, [#allocation6], %s1140_s13, %s1140_s13, %s1141_s14  }
   0x8   :  { %s1142_s15 = smov [#allocation8]   ;;  %s1143_s17 = smov 64  }
   0x9   :  { %s63_s16 = sshll.u32 %s1142_s15, 4  ;;  %s1144_s1 = smov 4   ;;  %s64_s16 = int_to_ptr.vmem [resolvable:$true] %s63_s16 }
   0xa   :  { %69 = dma.hbm_to_vmem [thread:$0]  %s62_s12, 256, %s64_s16, [#allocation9], %s1143_s17, %s1143_s17, %s1144_s1  }
   0xb   :  { %s87_s3 = sshll.u32 %s1376_s5, 4  ;;  %s1145_s20 = smov [#allocation11]   ;;  %s88_s3 = int_to_ptr.hbm [resolvable:$true] %s87_s3 }
   0xc   :  { %s89_s21 = sshll.u32 %s1145_s20, 4  ;;  %s22_s24 = sshll.u32 %s1371_s0, 4  ;;  %s90_s21 = int_to_ptr.vmem [resolvable:$true] %s89_s21  ;;  %s23_s24 = int_to_ptr.hbm [resolvable:$true] %s22_s24 }
   0xd   :  { %95 = dma.hbm_to_vmem [thread:$0]  %s88_s3, 256, %s90_s21, [#allocation12], %s1143_s17, %s1143_s17, %s1144_s1  }
   0xe   :  { %s1146_s25 = smov [#allocation2]   ;;  %s48_s29 = sshll.u32 %s1373_s2, 4  ;;  %s49_s29 = int_to_ptr.hbm [resolvable:$true] %s48_s29 }
   0xf   :  { %s24_s26 = sshll.u32 %s1146_s25, 4  ;;  %s74_s0 = sshll.u32 %s1375_s4, 4  ;;  %s25_s26 = int_to_ptr.vmem [resolvable:$true] %s24_s26  ;;  %s75_s0 = int_to_ptr.hbm [resolvable:$true] %s74_s0 }
  0x10   :  { %30 = dma.hbm_to_vmem [thread:$0]  %s23_s24, 256, %s25_s26, [#allocation3], %s1140_s13, %s1140_s13, %s1141_s14  }
  0x11   :  { %s1147_s9 = smov [#allocation7]   ;;  %s1148_s11 = smov [#allocation10]  }
  0x12   :  { %s50_s10 = sshll.u32 %s1147_s9, 4  ;;  %s76_s2 = sshll.u32 %s1148_s11, 4  ;;  %s51_s10 = int_to_ptr.vmem [resolvable:$true] %s50_s10  ;;  %s77_s2 = int_to_ptr.vmem [resolvable:$true] %s76_s2 }
  0x13   :  { %56 = dma.hbm_to_vmem [thread:$0]  %s49_s29, 256, %s51_s10, [#allocation6], %s1140_s13, %s1140_s13, %s1141_s14  }
  0x14   :  { %s100_s16 = sshll.u32 %s1377_s6, 4  ;;  %s1149_s4 = smov [#allocation13]   ;;  %s101_s16 = int_to_ptr.hbm [resolvable:$true] %s100_s16 }
  0x15   :  { %82 = dma.hbm_to_vmem [thread:$0]  %s75_s0, 256, %s77_s2, [#allocation9], %s1143_s17, %s1143_s17, %s1144_s1  }
  0x16   :  { %s102_s18 = sshll.u32 %s1149_s4, 4  ;;  %s103_s18 = int_to_ptr.vmem [resolvable:$true] %s102_s18 }
  0x17   :  { %108 = dma.hbm_to_vmem [thread:$0]  %s101_s16, 256, %s103_s18, [#allocation12], %s1143_s17, %s1143_s17, %s1144_s1  }
  0x18   :  { %1129 = dma.done.wait [#allocation3], 256  }
  0x19   :  { %1130 = vsyncadd [#allocation3], 4294967040 }
  0x1a   :  { %1131 = dma.done.wait [#allocation6], 512  }
  0x1b   :  { %1132 = vsyncadd [#allocation6], 4294966784 }
  0x1c   :  { %1133 = dma.done.wait [#allocation9], 512  }
  0x1d   :  { %1134 = vsyncadd [#allocation9], 4294966784 }
  0x1e   :  { %1135 = dma.done.wait [#allocation12], 512  }
  0x1f   :  { %1136 = vsyncadd [#allocation12], 4294966784  ;;  %v884_v0 = vld [vmem:[#allocation8 + $0x8] sm:$0xff]  ;;  %v886_v1 = vld [vmem:[#allocation10 + $0x8] sm:$0xff]  ;;  %vm165_vm0 = vcmask 261120   ;;  %vm255_vm1 = vcmask 64512  }
  0x20   :  { %v883_v2 = vld [vmem:[#allocation8] sm:$0xff]  ;;  %v885_v3 = vld [vmem:[#allocation10] sm:$0xff]  ;;  %v141_v5 = vld [vmem:[#allocation2 + $0x8] sm:$0xff]  ;;  %175 = vmatpush.bf16.msra.mxu0 %v884_v0  ;;  %210 = vmatpush.bf16.msra.mxu1 %v886_v1  ;;  %s1150_s6 = smov 120   ;;  %s1151_s17 = smov 112   ;;  %vm321_vm2 = vcmask 1043456  }
  0x21   :  { %v140_v4 = vld [vmem:[#allocation2] sm:$0xff]  ;;  %v143_v6 = vld [vmem:[#allocation5] sm:$0xff]  ;;  %v144_v7 = vld [vmem:[#allocation5 + $0x8] sm:$0xff]  ;;  %s1152_s1 = smov 104   ;;  %s1153_s20 = smov [#allocation14]  }
  0x22   :  { %v142_v8 = vpack.c.bf16 %v141_v5, %v140_v4  ;;  %v145_v9 = vpack.c.bf16 %v144_v7, %v143_v6  ;;  %v888_v28 = vld [vmem:[#allocation11 + $0x8] sm:$0xff]  ;;  %v887_v29 = vld [vmem:[#allocation11] sm:$0xff]  ;;  %v146_v30 = vld [vmem:[#allocation7] sm:$0xff]  ;;  %s818_s21 = sshll.u32 %s1153_s20, 4  ;;  %s820_s24 = sshll.u32 %s1379_s8, 4  ;;  %s819_s21 = int_to_ptr.vmem [resolvable:$true] %s818_s21  ;;  %s821_s24 = int_to_ptr.hbm [resolvable:$true] %s820_s24 }
  0x23   :  { %245 = vmatpush.bf16.msra.mxu2 %v888_v28  ;;  %v147_v31 = vld [vmem:[#allocation7 + $0x8] sm:$0xff] }
  0x24   :  { %176 = vmatpush.bf16.msra.mxu0 %v883_v2  ;;  %211 = vmatpush.bf16.msra.mxu1 %v885_v3  ;;  %v148_v32 = vpack.c.bf16 %v147_v31, %v146_v30 }
  0x27   :  { %844 = vmatmul.msk.bf16.vlgmr.msra.gmra.mxu0 %vm165_vm0, %v142_v8  ;;  %853 = vmatmul.msk.bf16.vlgmr.msra.gmra.mxu1 %vm165_vm0, %v145_v9 }
  0x28   :  { %246 = vmatpush.bf16.msra.mxu2 %v887_v29 }
  0x2b   :  { %862 = vmatmul.msk.bf16.vlgmr.msra.gmra.mxu2 %vm165_vm0, %v148_v32 }
  0xa4   :  { %v178_v10 = vpop.f32.mrf.mxu0  ;;  %v213_v11 = vpop.f32.mrf.mxu1 }
  0xa5   :  { %v218_v12 = vpack.c.bf16 %v213_v11, %v213_v11  ;;  %v183_v13 = vpack.c.bf16 %v178_v10, %v178_v10 }
  0xa7   :  { %v365_v14 = vunpack.c.l.b16 %v218_v12  ;;  %v260_v15 = vsel %vm255_vm1, %v218_v12, 0  ;;  %v360_v17 = vunpack.c.l.b16 %v183_v13 }
  0xa8   :  { %269 = vmatpush.bf16.xpose.msra.mxu3 %v260_v15 }
  0xa9   :  { %v1244_v16 = vpack.c.b16 %v365_v14, %v365_v14  ;;  %v1248_v21 = vpack.c.b16 %v360_v17, %v360_v17 }
  0xab   :  { %367 = vrot.lane.b32.xlu0 %v1244_v16, %s1150_s6 }
  0xac   :  { %v215_v18 = vpop.f32.mrf.mxu1  ;;  %v180_v20 = vpop.f32.mrf.mxu0 }
  0xad   :  { %v219_v19 = vpack.c.bf16 %v215_v18, %v215_v18  ;;  %v184_v24 = vpack.c.bf16 %v180_v20, %v180_v20 }
  0xae   :  { %v248_v54 = vpop.f32.mrf.mxu2 }
  0xaf   :  { %v394_v22 = vunpack.c.l.b16 %v219_v19  ;;  %863 = vmatmul.msk.bf16.vlgmr.msra.gmra.mxu3 %vm255_vm1, %v183_v13  ;;  %v279_v23 = vsel %vm255_vm1, %v219_v19, 0  ;;  %v389_v26 = vunpack.c.l.b16 %v184_v24  ;;  %v253_v55 = vpack.c.bf16 %v248_v54, %v248_v54 }
  0xb0   :  { %288 = vmatpush.bf16.xpose.msrb.mxu0 %v279_v23 }
  0xb1   :  { %v1252_v25 = vpack.c.b16 %v394_v22, %v394_v22  ;;  %v1259_v27 = vpack.c.b16 %v389_v26, %v389_v26  ;;  %v442_v56 = vunpack.c.l.b16 %v253_v55  ;;  %v323_v63 = vsel %vm321_vm2, %v253_v55, 0 }
  0xb2   :  { %332 = vmatpush.bf16.msrb.mxu1 %v323_v63 }
  0xb3   :  { %396 = vrot.lane.b32.xlu1 %v1252_v25, %s1150_s6  ;;  %362 = vrot.lane.b32.xlu0 %v1248_v21, %s1150_s6  ;;  %v1275_v57 = vpack.c.b16 %v442_v56, %v442_v56 }
  0xb6   :  { %v250_v58 = vpop.f32.mrf.mxu2 }
  0xb7   :  { %864 = vmatmul.msk.bf16.vlgmr.msrb.gmra.mxu0 %vm255_vm1, %v184_v24  ;;  %v254_v59 = vpack.c.bf16 %v250_v58, %v250_v58 }
  0xb9   :  { %v466_v60 = vunpack.c.l.b16 %v254_v59  ;;  %v342_v3 = vsel %vm321_vm2, %v254_v59, 0  ;;  %v491_v59 = vld [vmem:[#allocation13 + $0x4] sm:$0xf] }
  0xba   :  { %351 = vmatpush.bf16.msrb.mxu2 %v342_v3 }
  0xbb   :  { %391 = vrot.lane.b32.xlu1 %v1259_v27, %s1150_s6  ;;  %v1283_v61 = vpack.c.b16 %v466_v60, %v466_v60  ;;  %v496_v60 = vsel %vm321_vm2, %v491_v59, 0 }
 0x11d   :  { %v368_v33 = vpop.permute.xlu0 %367 }
 0x11e   :  { %v373_v34 = vsel %vm255_vm1, %v368_v33, 0 }
 0x11f   :  { %382 = vmatpush.bf16.xpose.msrb.mxu3 %v373_v34 }
 0x125   :  { %v397_v35 = vpop.permute.xlu1 %396  ;;  %v363_v36 = vpop.permute.xlu0 %362 }
 0x126   :  { %v402_v37 = vsel %vm255_vm1, %v397_v35, 0  ;;  %867 = vmatmul.msk.bf16.vlgmr.msrb.gmra.mxu3 %vm255_vm1, %v363_v36 }
 0x127   :  { %411 = vmatpush.bf16.xpose.msra.mxu0 %v402_v37  ;;  %505 = vmatpush.bf16.msra.mxu3 %v496_v60 }
 0x12d   :  { %v392_v38 = vpop.permute.xlu1 %391 }
 0x12e   :  { %868 = vmatmul.msk.bf16.vlgmr.msra.gmra.mxu0 %vm255_vm1, %v392_v38 }
 0x132   :  { %v271_v39 = vpop.f32.mrf.mxu3 }
 0x133   :  { %v294_v40 = vsel %vm255_vm1, %v271_v39, -inf }
 0x134   :  { %295 = vmax.xlane.f32.xlu2 %v294_v40  ;;  %v1269_v41 = vpop.f32.mrf.mxu0 }
 0x135   :  { %v297_v62 = vsel %vm255_vm1, %v1269_v41, -inf }
 0x13a   :  { %v273_v42 = vpop.f32.mrf.mxu3 }
 0x13c   :  { %v292_v43 = vpop.f32.mrf.mxu0 }
 0x1a7   :  { %v296_v44 = vpop.xlane.xlu2 %295 }
 0x1a8   :  { %v300_v45 = vsub.f32 %v271_v39, %v296_v44 }
 0x1a9   :  { %v384_v46 = vpop.f32.mrf.mxu3 }
 0x1aa   :  { %v302_v47 = vmul.f32 1.442695, %v300_v45  ;;  %v417_v48 = vsel %vm255_vm1, %v384_v46, -inf }
 0x1ab   :  { %418 = vmax.xlane.f32.xlu2 %v417_v48  ;;  %v1272_v49 = vpop.f32.mrf.mxu0 }
 0x1ac   :  { %905 = vpow2.f32 %v302_v47  ;;  %v420_v13 = vsel %vm255_vm1, %v1272_v49, -inf }
 0x1b1   :  { %v386_v50 = vpop.f32.mrf.mxu3 }
 0x1b2   :  { %v906_v51 = vpop.eup %905 }
 0x1b3   :  { %v415_v52 = vpop.f32.mrf.mxu0  ;;  %v306_v53 = vsel %vm255_vm1, %v906_v51, 0.0 }
 0x1b4   :  { %307 = vadd.xlane.f32.xlu0 %v306_v53  ;;  %v358_v53 = vld [vmem:[#allocation13] sm:$0xf] }
 0x1b5   :  { %v516_v54 = vsel %vm321_vm2, %v358_v53, 0 }
 0x1b6   :  { %525 = vmatpush.bf16.msrb.mxu0 %v516_v54 }
 0x1c3   :  { %444 = vrot.lane.b32.xlu2 %v1275_v57, %s1150_s6 }
 0x1c8   :  { %532 = vrot.lane.b32.xlu0 %v1248_v21, %s1151_s17 }
 0x1cb   :  { %534 = vrot.lane.b32.xlu2 %v1244_v16, %s1151_s17 }
 0x1d0   :  { %468 = vrot.lane.b32.xlu0 %v1283_v61, %s1150_s6 }
 0x1d8   :  { %555 = vrot.lane.b32.xlu0 %v1259_v27, %s1151_s17 }
 0x1f4   :  { %298 = vmax.xlane.f32.xlu2 %v297_v62 }
 0x21e   :  { %v419_v0 = vpop.xlane.xlu2 %418 }
 0x21f   :  { %v423_v1 = vsub.f32 %v384_v46, %v419_v0 }
 0x221   :  { %v425_v2 = vmul.f32 1.442695, %v423_v1 }
 0x223   :  { %907 = vpow2.f32 %v425_v2 }
 0x226   :  { %v445_v4 = vpop.permute.xlu2 %444 }
 0x227   :  { %v450_v5 = vsel %vm321_vm2, %v445_v4, 0  ;;  %v308_v6 = vpop.xlane.xlu0 %307 }
 0x228   :  { %909 = vrcp.f32 %v308_v6  ;;  %459 = vmatpush.bf16.msra.mxu1 %v450_v5 }
 0x229   :  { %v908_v7 = vpop.eup %907 }
 0x22a   :  { %v429_v8 = vsel %vm255_vm1, %v908_v7, 0.0 }
 0x22b   :  { %430 = vadd.xlane.f32.xlu1 %v429_v8 }
 0x22e   :  { %v910_v9 = vpop.eup %909  ;;  %v535_v11 = vpop.permute.xlu2 %534 }
 0x22f   :  { %v314_v10 = vmul.f32 %v910_v9, %v906_v51  ;;  %v540_v14 = vsel %vm255_vm1, %v535_v11, 0 }
 0x231   :  { %v316_v12 = vpack.c.bf16 %v314_v10, %v314_v10 }
 0x233   :  { %865 = vmatmul.msk.bf16.vlgmr.msrb.gmra.mxu1 %vm255_vm1, %v316_v12  ;;  %421 = vmax.xlane.f32.xlu1 %v420_v13 }
 0x234   :  { %549 = vmatpush.bf16.xpose.msrb.mxu1 %v540_v14 }
 0x23a   :  { %v533_v15 = vpop.permute.xlu0 %532 }
 0x242   :  { %v469_v17 = vpop.permute.xlu0 %468 }
 0x243   :  { %v474_v18 = vsel %vm321_vm2, %v469_v17, 0 }
 0x244   :  { %483 = vmatpush.bf16.msra.mxu2 %v474_v18 }
 0x24a   :  { %v556_v50 = vpop.permute.xlu0 %555 }
 0x267   :  { %v299_v19 = vpop.xlane.xlu2 %298 }
 0x268   :  { %v301_v20 = vsub.f32 %v1269_v41, %v299_v19 }
 0x26a   :  { %v304_v22 = vmul.f32 1.442695, %v301_v20 }
 0x26c   :  { %911 = vpow2.f32 %v304_v22 }
 0x272   :  { %v912_v23 = vpop.eup %911 }
 0x273   :  { %v309_v24 = vsel %vm255_vm1, %v912_v23, 0.0 }
 0x274   :  { %310 = vadd.xlane.f32.xlu1 %v309_v24 }
 0x29e   :  { %v431_v26 = vpop.xlane.xlu1 %430 }
 0x29f   :  { %913 = vrcp.f32 %v431_v26 }
 0x2a5   :  { %v914_v28 = vpop.eup %913 }
 0x2a6   :  { %v437_v29 = vmul.f32 %v914_v28, %v908_v7  ;;  %v422_v30 = vpop.xlane.xlu1 %421 }
 0x2a7   :  { %v424_v31 = vsub.f32 %v1272_v49, %v422_v30 }
 0x2a8   :  { %v439_v32 = vpack.c.bf16 %v437_v29, %v437_v29 }
 0x2a9   :  { %v427_v33 = vmul.f32 1.442695, %v424_v31 }
 0x2aa   :  { %869 = vmatmul.msk.bf16.vlgmr.msra.gmra.mxu1 %vm255_vm1, %v439_v32 }
 0x2ab   :  { %915 = vpow2.f32 %v427_v33 }
 0x2b0   :  { %v334_v34 = vpop.f32.mrf.mxu1 }
 0x2b1   :  { %v916_v35 = vpop.eup %915 }
 0x2b2   :  { %v432_v36 = vsel %vm255_vm1, %v916_v35, 0.0 }
 0x2b3   :  { %433 = vadd.xlane.f32.xlu1 %v432_v36 }
 0x2b8   :  { %v336_v37 = vpop.f32.mrf.mxu1 }
 0x2ba   :  { %873 = vmatmul.msk.bf16.vlgmr.msrb.gmra.mxu1 %vm255_vm1, %v533_v15 }
 0x2cc   :  { %557 = vrot.lane.b32.xlu1 %v1252_v25, %s1151_s17 }
 0x2d4   :  { %671 = vrot.lane.b32.xlu1 %v1244_v16, %s1152_s1 }
 0x2dc   :  { %694 = vrot.lane.b32.xlu1 %v1252_v25, %s1152_s1 }
 0x2e4   :  { %692 = vrot.lane.b32.xlu1 %v1259_v27, %s1152_s1 }
 0x2e7   :  { %v311_v38 = vpop.xlane.xlu1 %310 }
 0x2e8   :  { %917 = vrcp.f32 %v311_v38 }
 0x2ee   :  { %v918_v39 = vpop.eup %917 }
 0x2ef   :  { %v315_v40 = vmul.f32 %v918_v39, %v912_v23 }
 0x2f1   :  { %v317_v41 = vpack.c.bf16 %v315_v40, %v315_v40 }
 0x2f3   :  { %866 = vmatmul.msk.bf16.vlgmr.msrb.gmra.mxu2 %vm255_vm1, %v317_v41 }
 0x326   :  { %v434_v42 = vpop.xlane.xlu1 %433 }
 0x327   :  { %919 = vrcp.f32 %v434_v42  ;;  %v461_v43 = vpop.f32.mrf.mxu1 }
 0x32d   :  { %v920_v44 = vpop.eup %919 }
 0x32e   :  { %v438_v45 = vmul.f32 %v920_v44, %v916_v35 }
 0x32f   :  { %v463_v46 = vpop.f32.mrf.mxu1 }
 0x330   :  { %v440_v16 = vpack.c.bf16 %v438_v45, %v438_v45 }
 0x332   :  { %870 = vmatmul.msk.bf16.vlgmr.msra.gmra.mxu2 %vm255_vm1, %v440_v16 }
 0x337   :  { %v551_v25 = vpop.f32.mrf.mxu1 }
 0x338   :  { %v578_v47 = vsel %vm255_vm1, %v551_v25, -inf }
 0x339   :  { %579 = vmax.xlane.f32.xlu2 %v578_v47 }
 0x33e   :  { %v558_v27 = vpop.permute.xlu1 %557 }
 0x33f   :  { %v563_v48 = vsel %vm255_vm1, %v558_v27, 0  ;;  %v553_v49 = vpop.f32.mrf.mxu1  ;;  %v646_v27 = vld [vmem:[#allocation13 + $0x8] sm:$0xf] }
 0x340   :  { %572 = vmatpush.bf16.xpose.msrb.mxu2 %v563_v48  ;;  %v651_v48 = vsel %vm321_vm2, %v646_v27, 0 }
 0x341   :  { %660 = vmatpush.bf16.msra.mxu1 %v651_v48 }
 0x346   :  { %v672_v51 = vpop.permute.xlu1 %671 }
 0x347   :  { %v677_v52 = vsel %vm255_vm1, %v672_v51, 0  ;;  %874 = vmatmul.msk.bf16.vlgmr.msrb.gmra.mxu2 %vm255_vm1, %v556_v50 }
 0x348   :  { %686 = vmatpush.bf16.xpose.msra.mxu2 %v677_v52 }
 0x34e   :  { %v695_v2 = vpop.permute.xlu1 %694 }
 0x34f   :  { %v700_v6 = vsel %vm255_vm1, %v695_v2, 0 }
 0x351   :  { %602 = vrot.lane.b32.xlu2 %v1275_v57, %s1151_s17 }
 0x356   :  { %v693_v31 = vpop.permute.xlu1 %692 }
 0x359   :  { %669 = vrot.lane.b32.xlu2 %v1248_v21, %s1152_s1 }
 0x376   :  { %v353_v55 = vpop.f32.mrf.mxu2 }
 0x377   :  { %v357_v56 = vpack.c.bf16 %v353_v55, %v334_v34 }
 0x379   :  { %872 = vmatmul.msk.bf16.vlgmr.msrb.gmra.mxu0 %vm255_vm1, %v357_v56 }
 0x37e   :  { %v355_v58 = vpop.f32.mrf.mxu2 }
 0x3ac   :  { %v580_v62 = vpop.xlane.xlu2 %579 }
 0x3ad   :  { %v584_v63 = vsub.f32 %v551_v25, %v580_v62 }
 0x3af   :  { %v586_v0 = vmul.f32 1.442695, %v584_v63 }
 0x3b1   :  { %921 = vpow2.f32 %v586_v0 }
 0x3b4   :  { %v603_v1 = vpop.permute.xlu2 %602 }
 0x3b5   :  { %v608_v3 = vsel %vm321_vm2, %v603_v1, 0  ;;  %v485_v4 = vpop.f32.mrf.mxu2 }
 0x3b6   :  { %v489_v5 = vpack.c.bf16 %v485_v4, %v461_v43  ;;  %617 = vmatpush.bf16.msrb.mxu3 %v608_v3 }
 0x3b7   :  { %v922_v21 = vpop.eup %921 }
 0x3b8   :  { %871 = vmatmul.msk.bf16.vlgmr.msra.gmra.mxu3 %vm255_vm1, %v489_v5  ;;  %v590_v7 = vsel %vm255_vm1, %v922_v21, 0.0 }
 0x3b9   :  { %591 = vadd.xlane.f32.xlu0 %v590_v7 }
 0x3ba   :  { %709 = vmatpush.bf16.xpose.msra.mxu3 %v700_v6 }
 0x3bc   :  { %v670_v8 = vpop.permute.xlu2 %669 }
 0x3bd   :  { %v487_v9 = vpop.f32.mrf.mxu2  ;;  %878 = vmatmul.msk.bf16.vlgmr.msra.gmra.mxu2 %vm255_vm1, %v670_v8 }
 0x3ca   :  { %v574_v10 = vpop.f32.mrf.mxu2 }
 0x3cb   :  { %v581_v11 = vsel %vm255_vm1, %v574_v10, -inf }
 0x3cc   :  { %582 = vmax.xlane.f32.xlu2 %v581_v11 }
 0x3cd   :  { %623 = vrot.lane.b32.xlu0 %v1283_v61, %s1151_s17 }
 0x3d2   :  { %v576_v12 = vpop.f32.mrf.mxu2 }
 0x3f6   :  { %v527_v18 = vpop.f32.mrf.mxu0 }
 0x3fe   :  { %v529_v49 = vpop.f32.mrf.mxu0 }
 0x42c   :  { %v592_v13 = vpop.xlane.xlu0 %591 }
 0x42d   :  { %923 = vrcp.f32 %v592_v13 }
 0x433   :  { %v924_v14 = vpop.eup %923 }
 0x434   :  { %v598_v15 = vmul.f32 %v924_v14, %v922_v21 }
 0x436   :  { %v600_v17 = vpack.c.bf16 %v598_v15, %v598_v15  ;;  %v904_v15 = vld [vmem:[%s1378_s7] ss:$0 sm:$0xff] }
 0x438   :  { %875 = vmatmul.msk.bf16.vlgmr.msrb.gmra.mxu3 %vm255_vm1, %v600_v17 }
 0x43b   :  { %v507_v19 = vpop.f32.mrf.mxu3 }
 0x43c   :  { %v1336_v20 = vadd.f32 %v527_v18, %v507_v19 }
 0x43f   :  { %v624_v22 = vpop.permute.xlu0 %623  ;;  %v583_v23 = vpop.xlane.xlu2 %582 }
 0x440   :  { %v629_v24 = vsel %vm321_vm2, %v624_v22, 0  ;;  %v585_v26 = vsub.f32 %v574_v10, %v583_v23  ;;  %v688_v28 = vpop.f32.mrf.mxu2  ;;  %v783_v10 = vld [vmem:[#allocation13 + $0xc] sm:$0xf] }
 0x441   :  { %638 = vmatpush.bf16.msra.mxu0 %v629_v24  ;;  %v715_v29 = vsel %vm255_vm1, %v688_v28, -inf  ;;  %v788_v11 = vsel %vm321_vm2, %v783_v10, 0 }
 0x442   :  { %v588_v30 = vmul.f32 1.442695, %v585_v26  ;;  %716 = vmax.xlane.f32.xlu0 %v715_v29  ;;  %797 = vmatpush.bf16.msrb.mxu2 %v788_v11 }
 0x443   :  { %v1342_v35 = vpop.f32.mrf.mxu3 }
 0x444   :  { %925 = vpow2.f32 %v588_v30 }
 0x448   :  { %v690_v32 = vpop.f32.mrf.mxu2  ;;  %879 = vmatmul.msk.bf16.vlgmr.msra.gmra.mxu3 %vm255_vm1, %v693_v31 }
 0x44a   :  { %v926_v33 = vpop.eup %925 }
 0x44b   :  { %v593_v34 = vsel %vm255_vm1, %v926_v33, 0.0 }
 0x44c   :  { %594 = vadd.xlane.f32.xlu1 %v593_v34 }
 0x4b5   :  { %v717_v36 = vpop.xlane.xlu0 %716 }
 0x4b6   :  { %v721_v37 = vsub.f32 %v688_v28, %v717_v36 }
 0x4b8   :  { %v723_v38 = vmul.f32 1.442695, %v721_v37 }
 0x4ba   :  { %927 = vpow2.f32 %v723_v38 }
 0x4bb   :  { %v619_v39 = vpop.f32.mrf.mxu3 }
 0x4bf   :  { %v595_v40 = vpop.xlane.xlu1 %594 }
 0x4c0   :  { %v928_v41 = vpop.eup %927  ;;  %929 = vrcp.f32 %v595_v40 }
 0x4c1   :  { %v727_v42 = vsel %vm255_vm1, %v928_v41, 0.0 }
 0x4c2   :  { %728 = vadd.xlane.f32.xlu1 %v727_v42 }
 0x4c3   :  { %v621_v43 = vpop.f32.mrf.mxu3 }
 0x4c6   :  { %v930_v44 = vpop.eup %929 }
 0x4c7   :  { %v599_v45 = vmul.f32 %v930_v44, %v926_v33 }
 0x4c9   :  { %v601_v46 = vpack.c.bf16 %v599_v45, %v599_v45 }
 0x4cb   :  { %876 = vmatmul.msk.bf16.vlgmr.msra.gmra.mxu0 %vm255_vm1, %v601_v46  ;;  %v711_v16 = vpop.f32.mrf.mxu3 }
 0x4cc   :  { %v718_v25 = vsel %vm255_vm1, %v711_v16, -inf }
 0x4cd   :  { %719 = vmax.xlane.f32.xlu2 %v718_v25 }
 0x4d3   :  { %v713_v47 = vpop.f32.mrf.mxu3 }
 0x4db   :  { %739 = vrot.lane.b32.xlu1 %v1275_v57, %s1152_s1 }
 0x535   :  { %v729_v50 = vpop.xlane.xlu1 %728 }
 0x536   :  { %931 = vrcp.f32 %v729_v50 }
 0x53c   :  { %v932_v55 = vpop.eup %931 }
 0x53d   :  { %v735_v59 = vmul.f32 %v932_v55, %v928_v41 }
 0x53f   :  { %v737_v63 = vpack.c.bf16 %v735_v59, %v735_v59 }
 0x540   :  { %v720_v51 = vpop.xlane.xlu2 %719 }
 0x541   :  { %v722_v52 = vsub.f32 %v711_v16, %v720_v51 }
 0x543   :  { %v725_v53 = vmul.f32 1.442695, %v722_v52 }
 0x545   :  { %933 = vpow2.f32 %v725_v53 }
 0x548   :  { %v640_v54 = vpop.f32.mrf.mxu0 }
 0x549   :  { %v644_v56 = vpack.c.bf16 %v640_v54, %v619_v39 }
 0x54b   :  { %v934_v58 = vpop.eup %933  ;;  %877 = vmatmul.msk.bf16.vlgmr.msra.gmra.mxu1 %vm255_vm1, %v644_v56 }
 0x54c   :  { %v730_v57 = vsel %vm255_vm1, %v934_v58, 0.0 }
 0x54d   :  { %731 = vadd.xlane.f32.xlu2 %v730_v57  ;;  %v740_v60 = vpop.permute.xlu1 %739 }
 0x54e   :  { %v745_v62 = vsel %vm321_vm2, %v740_v60, 0 }
 0x54f   :  { %754 = vmatpush.bf16.msrb.mxu0 %v745_v62 }
 0x550   :  { %v642_v0 = vpop.f32.mrf.mxu0 }
 0x552   :  { %880 = vmatmul.msk.bf16.vlgmr.msrb.gmra.mxu0 %vm255_vm1, %v737_v63 }
 0x565   :  { %760 = vrot.lane.b32.xlu2 %v1283_v61, %s1152_s1 }
 0x5c0   :  { %v732_v1 = vpop.xlane.xlu2 %731 }
 0x5c1   :  { %935 = vrcp.f32 %v732_v1 }
 0x5c7   :  { %v936_v2 = vpop.eup %935 }
 0x5c8   :  { %v736_v3 = vmul.f32 %v936_v2, %v934_v58  ;;  %v761_v4 = vpop.permute.xlu2 %760  ;;  %v662_v5 = vpop.f32.mrf.mxu1 }
 0x5c9   :  { %v766_v21 = vsel %vm321_vm2, %v761_v4, 0  ;;  %v667_v6 = vadd.f32 %v662_v5, %v1336_v20  ;;  %v530_v20 = vadd.f32 %v529_v49, %v1342_v35 }
 0x5ca   :  { %v738_v7 = vpack.c.bf16 %v736_v3, %v736_v3  ;;  %775 = vmatpush.bf16.msrb.mxu1 %v766_v21 }
 0x5cd   :  { %881 = vmatmul.msk.bf16.vlgmr.msrb.gmra.mxu1 %vm255_vm1, %v738_v7 }
 0x5cf   :  { %v756_v8 = vpop.f32.mrf.mxu0 }
 0x5d0   :  { %v664_v61 = vpop.f32.mrf.mxu1 }
 0x5d1   :  { %v668_v22 = vadd.f32 %v664_v61, %v530_v20 }
 0x5d7   :  { %v758_v9 = vpop.f32.mrf.mxu0 }
 0x64a   :  { %v777_v12 = vpop.f32.mrf.mxu1 }
 0x64b   :  { %v781_v13 = vpack.c.bf16 %v777_v12, %v756_v8 }
 0x64d   :  { %882 = vmatmul.msk.bf16.vlgmr.msrb.gmra.mxu2 %vm255_vm1, %v781_v13 }
 0x652   :  { %v779_v14 = vpop.f32.mrf.mxu1 }
 0x6d0   :  { %v799_v17 = vpop.f32.mrf.mxu2 }
 0x6d1   :  { %v804_v18 = vadd.f32 %v799_v17, %v667_v6 }
 0x6d3   :  { %v810_v19 = vadd.f32 %v904_v15, %v804_v18 }
 0x6d5   :  { %812 = vst [vmem:[#allocation14] sm:$0xff] %v810_v19 }
 0x6d8   :  { %v801_v23 = vpop.f32.mrf.mxu2 }
 0x6d9   :  { %v805_v24 = vadd.f32 %v801_v23, %v668_v22 }
 0x6db   :  { %v811_v26 = vadd.f32 %v904_v15, %v805_v24 }
 0x6dd   :  { %813 = vst [vmem:[#allocation14 + $0x8] sm:$0xff] %v811_v26 }
 0x6de   :  { %826 = dma.vmem_to_hbm [thread:$0]  %s819_s21, 256, %s821_s24, [#allocation4], %s1140_s13, %s1140_s13, %s1141_s14  }
 0x6df   :  { %1137 = dma.done.wait [#allocation4], 256  }
 0x6e0   :  { %1138 = vsyncadd [#allocation4], 4294967040 }
 0x6e1   :  { %831 = vsyncpa [#allocation3], 1 }
 0x6e2   :  { %832 = vsyncpa [#allocation6], 1 }
 0x6e3   :  { %833 = vsyncpa [#allocation9], 1 }
 0x6e4   :  { %834 = vsyncpa [#allocation12], 1 }
 0x6e5   :  { %835 = vsyncpa [#allocation4], 1 }

// kernel: tpu_custom_call.1
= control target key start
LH: loop header
LB: loop body
LE: loop exit
PB: predicated region body
PF: predicated region fallthrough
CT: control target
= control target key end

     0   :  { %13 = vsyncpa [#allocation3], 0  ;;  %s1371_s0 = inlined_call_operand.hbm [shape: f32[2,8,32], index: 0, kind: input, shape index: {}]   ;;  %s1372_s1 = inlined_call_operand.hbm [shape: f32[2,8,32], index: 1, kind: input, shape index: {}]   ;;  %s1373_s2 = inlined_call_operand.hbm [shape: f32[2,8,32], index: 2, kind: input, shape index: {}]   ;;  %s1374_s3 = inlined_call_operand.hbm [shape: bf16[32,32], index: 3, kind: input, shape index: {}]   ;;  %s1375_s4 = inlined_call_operand.hbm [shape: bf16[32,32], index: 4, kind: input, shape index: {}]   ;;  %s1376_s5 = inlined_call_operand.hbm [shape: bf16[32,32], index: 5, kind: input, shape index: {}]   ;;  %s1377_s6 = inlined_call_operand.hbm [shape: bf16[4,8,128], index: 6, kind: input, shape index: {}]   ;;  %s1378_s7 = inlined_call_operand.vmem [shape: f32[1,128], index: 7, kind: input, shape index: {}]   ;;  %s1379_s8 = inlined_call_operand.hbm [shape: f32[2,8,128], index: 8, kind: output, shape index: {}]  }
   0x1   :  { %14 = vsyncpa [#allocation6], 0 }
   0x2   :  { %15 = vsyncpa [#allocation9], 0 }
   0x3   :  { %16 = vsyncpa [#allocation12], 0 }
   0x4   :  { %17 = vsyncpa [#allocation4], 0  ;;  %s35_s29 = sshll.u32 %s1372_s1, 4  ;;  %s1139_s30 = smov [#allocation5]   ;;  %s36_s29 = int_to_ptr.hbm [resolvable:$true] %s35_s29 }
   0x5   :  { %s37_s9 = sshll.u32 %s1139_s30, 4  ;;  %s61_s12 = sshll.u32 %s1374_s3, 4  ;;  %s38_s9 = int_to_ptr.vmem [resolvable:$true] %s37_s9  ;;  %s62_s12 = int_to_ptr.hbm [resolvable:$true] %s61_s12 }
   0x6   :  { %s1140_s13 = smov 128   ;;  %s1141_s14 = smov 8  }
   0x7   :  { %43 = dma.hbm_to_vmem [thread:$0]  %s36_s29, 256, %s38_s9, [#allocation6], %s1140_s13, %s1140_s13, %s1141_s14  }
   0x8   :  { %s1142_s15 = smov [#allocation8]   ;;  %s1143_s17 = smov 64  }
   0x9   :  { %s63_s16 = sshll.u32 %s1142_s15, 4  ;;  %s1144_s1 = smov 4   ;;  %s64_s16 = int_to_ptr.vmem [resolvable:$true] %s63_s16 }
   0xa   :  { %69 = dma.hbm_to_vmem [thread:$0]  %s62_s12, 256, %s64_s16, [#allocation9], %s1143_s17, %s1143_s17, %s1144_s1  }
   0xb   :  { %s87_s3 = sshll.u32 %s1376_s5, 4  ;;  %s1145_s20 = smov [#allocation11]   ;;  %s88_s3 = int_to_ptr.hbm [resolvable:$true] %s87_s3 }
   0xc   :  { %s89_s21 = sshll.u32 %s1145_s20, 4  ;;  %s22_s24 = sshll.u32 %s1371_s0, 4  ;;  %s90_s21 = int_to_ptr.vmem [resolvable:$true] %s89_s21  ;;  %s23_s24 = int_to_ptr.hbm [resolvable:$true] %s22_s24 }
   0xd   :  { %95 = dma.hbm_to_vmem [thread:$0]  %s88_s3, 256, %s90_s21, [#allocation12], %s1143_s17, %s1143_s17, %s1144_s1  }
   0xe   :  { %s1146_s25 = smov [#allocation2]   ;;  %s48_s29 = sshll.u32 %s1373_s2, 4  ;;  %s49_s29 = int_to_ptr.hbm [resolvable:$true] %s48_s29 }
   0xf   :  { %s24_s26 = sshll.u32 %s1146_s25, 4  ;;  %s74_s0 = sshll.u32 %s1375_s4, 4  ;;  %s25_s26 = int_to_ptr.vmem [resolvable:$true] %s24_s26  ;;  %s75_s0 = int_to_ptr.hbm [resolvable:$true] %s74_s0 }
  0x10   :  { %30 = dma.hbm_to_vmem [thread:$0]  %s23_s24, 256, %s25_s26, [#allocation3], %s1140_s13, %s1140_s13, %s1141_s14  }
  0x11   :  { %s1147_s9 = smov [#allocation7]   ;;  %s1148_s11 = smov [#allocation10]  }
  0x12   :  { %s50_s10 = sshll.u32 %s1147_s9, 4  ;;  %s76_s2 = sshll.u32 %s1148_s11, 4  ;;  %s51_s10 = int_to_ptr.vmem [resolvable:$true] %s50_s10  ;;  %s77_s2 = int_to_ptr.vmem [resolvable:$true] %s76_s2 }
  0x13   :  { %56 = dma.hbm_to_vmem [thread:$0]  %s49_s29, 256, %s51_s10, [#allocation6], %s1140_s13, %s1140_s13, %s1141_s14  }
  0x14   :  { %s100_s16 = sshll.u32 %s1377_s6, 4  ;;  %s1149_s4 = smov [#allocation13]   ;;  %s101_s16 = int_to_ptr.hbm [resolvable:$true] %s100_s16 }
  0x15   :  { %82 = dma.hbm_to_vmem [thread:$0]  %s75_s0, 256, %s77_s2, [#allocation9], %s1143_s17, %s1143_s17, %s1144_s1  }
  0x16   :  { %s102_s18 = sshll.u32 %s1149_s4, 4  ;;  %s103_s18 = int_to_ptr.vmem [resolvable:$true] %s102_s18 }
  0x17   :  { %108 = dma.hbm_to_vmem [thread:$0]  %s101_s16, 256, %s103_s18, [#allocation12], %s1143_s17, %s1143_s17, %s1144_s1  }
  0x18   :  { %1129 = dma.done.wait [#allocation3], 256  }
  0x19   :  { %1130 = vsyncadd [#allocation3], 4294967040 }
  0x1a   :  { %1131 = dma.done.wait [#allocation6], 512  }
  0x1b   :  { %1132 = vsyncadd [#allocation6], 4294966784 }
  0x1c   :  { %1133 = dma.done.wait [#allocation9], 512  }
  0x1d   :  { %1134 = vsyncadd [#allocation9], 4294966784 }
  0x1e   :  { %1135 = dma.done.wait [#allocation12], 512  }
  0x1f   :  { %1136 = vsyncadd [#allocation12], 4294966784  ;;  %v884_v0 = vld [vmem:[#allocation8 + $0x8] sm:$0xff]  ;;  %v886_v1 = vld [vmem:[#allocation10 + $0x8] sm:$0xff]  ;;  %vm165_vm0 = vcmask 261120   ;;  %vm255_vm1 = vcmask 64512  }
  0x20   :  { %v883_v2 = vld [vmem:[#allocation8] sm:$0xff]  ;;  %v885_v3 = vld [vmem:[#allocation10] sm:$0xff]  ;;  %v141_v5 = vld [vmem:[#allocation2 + $0x8] sm:$0xff]  ;;  %175 = vmatpush.bf16.msra.mxu0 %v884_v0  ;;  %210 = vmatpush.bf16.msra.mxu1 %v886_v1  ;;  %s1150_s6 = smov 120   ;;  %s1151_s17 = smov 112   ;;  %vm321_vm2 = vcmask 1043456  }
  0x21   :  { %v140_v4 = vld [vmem:[#allocation2] sm:$0xff]  ;;  %v143_v6 = vld [vmem:[#allocation5] sm:$0xff]  ;;  %v144_v7 = vld [vmem:[#allocation5 + $0x8] sm:$0xff]  ;;  %s1152_s1 = smov 104   ;;  %s1153_s20 = smov [#allocation14]  }
  0x22   :  { %v142_v8 = vpack.c.bf16 %v141_v5, %v140_v4  ;;  %v145_v9 = vpack.c.bf16 %v144_v7, %v143_v6  ;;  %v888_v28 = vld [vmem:[#allocation11 + $0x8] sm:$0xff]  ;;  %v887_v29 = vld [vmem:[#allocation11] sm:$0xff]  ;;  %v146_v30 = vld [vmem:[#allocation7] sm:$0xff]  ;;  %s818_s21 = sshll.u32 %s1153_s20, 4  ;;  %s820_s24 = sshll.u32 %s1379_s8, 4  ;;  %s819_s21 = int_to_ptr.vmem [resolvable:$true] %s818_s21  ;;  %s821_s24 = int_to_ptr.hbm [resolvable:$true] %s820_s24 }
  0x23   :  { %245 = vmatpush.bf16.msra.mxu2 %v888_v28  ;;  %v147_v31 = vld [vmem:[#allocation7 + $0x8] sm:$0xff] }
  0x24   :  { %176 = vmatpush.bf16.msra.mxu0 %v883_v2  ;;  %211 = vmatpush.bf16.msra.mxu1 %v885_v3  ;;  %v148_v32 = vpack.c.bf16 %v147_v31, %v146_v30 }
  0x27   :  { %844 = vmatmul.msk.bf16.vlgmr.msra.gmra.mxu0 %vm165_vm0, %v142_v8  ;;  %853 = vmatmul.msk.bf16.vlgmr.msra.gmra.mxu1 %vm165_vm0, %v145_v9 }
  0x28   :  { %246 = vmatpush.bf16.msra.mxu2 %v887_v29 }
  0x2b   :  { %862 = vmatmul.msk.bf16.vlgmr.msra.gmra.mxu2 %vm165_vm0, %v148_v32 }
  0xa4   :  { %v178_v10 = vpop.f32.mrf.mxu0  ;;  %v213_v11 = vpop.f32.mrf.mxu1 }
  0xa5   :  { %v218_v12 = vpack.c.bf16 %v213_v11, %v213_v11  ;;  %v183_v13 = vpack.c.bf16 %v178_v10, %v178_v10 }
  0xa7   :  { %v365_v14 = vunpack.c.l.b16 %v218_v12  ;;  %v260_v15 = vsel %vm255_vm1, %v218_v12, 0  ;;  %v360_v17 = vunpack.c.l.b16 %v183_v13 }
  0xa8   :  { %269 = vmatpush.bf16.xpose.msra.mxu3 %v260_v15 }
  0xa9   :  { %v1244_v16 = vpack.c.b16 %v365_v14, %v365_v14  ;;  %v1248_v21 = vpack.c.b16 %v360_v17, %v360_v17 }
  0xab   :  { %367 = vrot.lane.b32.xlu0 %v1244_v16, %s1150_s6 }
  0xac   :  { %v215_v18 = vpop.f32.mrf.mxu1  ;;  %v180_v20 = vpop.f32.mrf.mxu0 }
  0xad   :  { %v219_v19 = vpack.c.bf16 %v215_v18, %v215_v18  ;;  %v184_v24 = vpack.c.bf16 %v180_v20, %v180_v20 }
  0xae   :  { %v248_v54 = vpop.f32.mrf.mxu2 }
  0xaf   :  { %v394_v22 = vunpack.c.l.b16 %v219_v19  ;;  %863 = vmatmul.msk.bf16.vlgmr.msra.gmra.mxu3 %vm255_vm1, %v183_v13  ;;  %v279_v23 = vsel %vm255_vm1, %v219_v19, 0  ;;  %v389_v26 = vunpack.c.l.b16 %v184_v24  ;;  %v253_v55 = vpack.c.bf16 %v248_v54, %v248_v54 }
  0xb0   :  { %288 = vmatpush.bf16.xpose.msrb.mxu0 %v279_v23 }
  0xb1   :  { %v1252_v25 = vpack.c.b16 %v394_v22, %v394_v22  ;;  %v1259_v27 = vpack.c.b16 %v389_v26, %v389_v26  ;;  %v442_v56 = vunpack.c.l.b16 %v253_v55  ;;  %v323_v63 = vsel %vm321_vm2, %v253_v55, 0 }
  0xb2   :  { %332 = vmatpush.bf16.msrb.mxu1 %v323_v63 }
  0xb3   :  { %396 = vrot.lane.b32.xlu1 %v1252_v25, %s1150_s6  ;;  %362 = vrot.lane.b32.xlu0 %v1248_v21, %s1150_s6  ;;  %v1275_v57 = vpack.c.b16 %v442_v56, %v442_v56 }
  0xb6   :  { %v250_v58 = vpop.f32.mrf.mxu2 }
  0xb7   :  { %864 = vmatmul.msk.bf16.vlgmr.msrb.gmra.mxu0 %vm255_vm1, %v184_v24  ;;  %v254_v59 = vpack.c.bf16 %v250_v58, %v250_v58 }
  0xb9   :  { %v466_v60 = vunpack.c.l.b16 %v254_v59  ;;  %v342_v3 = vsel %vm321_vm2, %v254_v59, 0  ;;  %v491_v59 = vld [vmem:[#allocation13 + $0x4] sm:$0xf] }
  0xba   :  { %351 = vmatpush.bf16.msrb.mxu2 %v342_v3 }
  0xbb   :  { %391 = vrot.lane.b32.xlu1 %v1259_v27, %s1150_s6  ;;  %v1283_v61 = vpack.c.b16 %v466_v60, %v466_v60  ;;  %v496_v60 = vsel %vm321_vm2, %v491_v59, 0 }
 0x11d   :  { %v368_v33 = vpop.permute.xlu0 %367 }
 0x11e   :  { %v373_v34 = vsel %vm255_vm1, %v368_v33, 0 }
 0x11f   :  { %382 = vmatpush.bf16.xpose.msrb.mxu3 %v373_v34 }
 0x125   :  { %v397_v35 = vpop.permute.xlu1 %396  ;;  %v363_v36 = vpop.permute.xlu0 %362 }
 0x126   :  { %v402_v37 = vsel %vm255_vm1, %v397_v35, 0  ;;  %867 = vmatmul.msk.bf16.vlgmr.msrb.gmra.mxu3 %vm255_vm1, %v363_v36 }
 0x127   :  { %411 = vmatpush.bf16.xpose.msra.mxu0 %v402_v37  ;;  %505 = vmatpush.bf16.msra.mxu3 %v496_v60 }
 0x12d   :  { %v392_v38 = vpop.permute.xlu1 %391 }
 0x12e   :  { %868 = vmatmul.msk.bf16.vlgmr.msra.gmra.mxu0 %vm255_vm1, %v392_v38 }
 0x132   :  { %v271_v39 = vpop.f32.mrf.mxu3 }
 0x133   :  { %v294_v40 = vsel %vm255_vm1, %v271_v39, -inf }
 0x134   :  { %295 = vmax.xlane.f32.xlu2 %v294_v40  ;;  %v1269_v41 = vpop.f32.mrf.mxu0 }
 0x135   :  { %v297_v62 = vsel %vm255_vm1, %v1269_v41, -inf }
 0x13a   :  { %v273_v42 = vpop.f32.mrf.mxu3 }
 0x13c   :  { %v292_v43 = vpop.f32.mrf.mxu0 }
 0x1a7   :  { %v296_v44 = vpop.xlane.xlu2 %295 }
 0x1a8   :  { %v300_v45 = vsub.f32 %v271_v39, %v296_v44 }
 0x1a9   :  { %v384_v46 = vpop.f32.mrf.mxu3 }
 0x1aa   :  { %v302_v47 = vmul.f32 1.442695, %v300_v45  ;;  %v417_v48 = vsel %vm255_vm1, %v384_v46, -inf }
 0x1ab   :  { %418 = vmax.xlane.f32.xlu2 %v417_v48  ;;  %v1272_v49 = vpop.f32.mrf.mxu0 }
 0x1ac   :  { %905 = vpow2.f32 %v302_v47  ;;  %v420_v13 = vsel %vm255_vm1, %v1272_v49, -inf }
 0x1b1   :  { %v386_v50 = vpop.f32.mrf.mxu3 }
 0x1b2   :  { %v906_v51 = vpop.eup %905 }
 0x1b3   :  { %v415_v52 = vpop.f32.mrf.mxu0  ;;  %v306_v53 = vsel %vm255_vm1, %v906_v51, 0.0 }
 0x1b4   :  { %307 = vadd.xlane.f32.xlu0 %v306_v53  ;;  %v358_v53 = vld [vmem:[#allocation13] sm:$0xf] }
 0x1b5   :  { %v516_v54 = vsel %vm321_vm2, %v358_v53, 0 }
 0x1b6   :  { %525 = vmatpush.bf16.msrb.mxu0 %v516_v54 }
 0x1c3   :  { %444 = vrot.lane.b32.xlu2 %v1275_v57, %s1150_s6 }
 0x1c8   :  { %532 = vrot.lane.b32.xlu0 %v1248_v21, %s1151_s17 }
 0x1cb   :  { %534 = vrot.lane.b32.xlu2 %v1244_v16, %s1151_s17 }
 0x1d0   :  { %468 = vrot.lane.b32.xlu0 %v1283_v61, %s1150_s6 }
 0x1d8   :  { %555 = vrot.lane.b32.xlu0 %v1259_v27, %s1151_s17 }
 0x1f4   :  { %298 = vmax.xlane.f32.xlu2 %v297_v62 }
 0x21e   :  { %v419_v0 = vpop.xlane.xlu2 %418 }
 0x21f   :  { %v423_v1 = vsub.f32 %v384_v46, %v419_v0 }
 0x221   :  { %v425_v2 = vmul.f32 1.442695, %v423_v1 }
 0x223   :  { %907 = vpow2.f32 %v425_v2 }
 0x226   :  { %v445_v4 = vpop.permute.xlu2 %444 }
 0x227   :  { %v450_v5 = vsel %vm321_vm2, %v445_v4, 0  ;;  %v308_v6 = vpop.xlane.xlu0 %307 }
 0x228   :  { %909 = vrcp.f32 %v308_v6  ;;  %459 = vmatpush.bf16.msra.mxu1 %v450_v5 }
 0x229   :  { %v908_v7 = vpop.eup %907 }
 0x22a   :  { %v429_v8 = vsel %vm255_vm1, %v908_v7, 0.0 }
 0x22b   :  { %430 = vadd.xlane.f32.xlu1 %v429_v8 }
 0x22e   :  { %v910_v9 = vpop.eup %909  ;;  %v535_v11 = vpop.permute.xlu2 %534 }
 0x22f   :  { %v314_v10 = vmul.f32 %v910_v9, %v906_v51  ;;  %v540_v14 = vsel %vm255_vm1, %v535_v11, 0 }
 0x231   :  { %v316_v12 = vpack.c.bf16 %v314_v10, %v314_v10 }
 0x233   :  { %865 = vmatmul.msk.bf16.vlgmr.msrb.gmra.mxu1 %vm255_vm1, %v316_v12  ;;  %421 = vmax.xlane.f32.xlu1 %v420_v13 }
 0x234   :  { %549 = vmatpush.bf16.xpose.msrb.mxu1 %v540_v14 }
 0x23a   :  { %v533_v15 = vpop.permute.xlu0 %532 }
 0x242   :  { %v469_v17 = vpop.permute.xlu0 %468 }
 0x243   :  { %v474_v18 = vsel %vm321_vm2, %v469_v17, 0 }
 0x244   :  { %483 = vmatpush.bf16.msra.mxu2 %v474_v18 }
 0x24a   :  { %v556_v50 = vpop.permute.xlu0 %555 }
 0x267   :  { %v299_v19 = vpop.xlane.xlu2 %298 }
 0x268   :  { %v301_v20 = vsub.f32 %v1269_v41, %v299_v19 }
 0x26a   :  { %v304_v22 = vmul.f32 1.442695, %v301_v20 }
 0x26c   :  { %911 = vpow2.f32 %v304_v22 }
 0x272   :  { %v912_v23 = vpop.eup %911 }
 0x273   :  { %v309_v24 = vsel %vm255_vm1, %v912_v23, 0.0 }
 0x274   :  { %310 = vadd.xlane.f32.xlu1 %v309_v24 }
 0x29e   :  { %v431_v26 = vpop.xlane.xlu1 %430 }
 0x29f   :  { %913 = vrcp.f32 %v431_v26 }
 0x2a5   :  { %v914_v28 = vpop.eup %913 }
 0x2a6   :  { %v437_v29 = vmul.f32 %v914_v28, %v908_v7  ;;  %v422_v30 = vpop.xlane.xlu1 %421 }
 0x2a7   :  { %v424_v31 = vsub.f32 %v1272_v49, %v422_v30 }
 0x2a8   :  { %v439_v32 = vpack.c.bf16 %v437_v29, %v437_v29 }
 0x2a9   :  { %v427_v33 = vmul.f32 1.442695, %v424_v31 }
 0x2aa   :  { %869 = vmatmul.msk.bf16.vlgmr.msra.gmra.mxu1 %vm255_vm1, %v439_v32 }
 0x2ab   :  { %915 = vpow2.f32 %v427_v33 }
 0x2b0   :  { %v334_v34 = vpop.f32.mrf.mxu1 }
 0x2b1   :  { %v916_v35 = vpop.eup %915 }
 0x2b2   :  { %v432_v36 = vsel %vm255_vm1, %v916_v35, 0.0 }
 0x2b3   :  { %433 = vadd.xlane.f32.xlu1 %v432_v36 }
 0x2b8   :  { %v336_v37 = vpop.f32.mrf.mxu1 }
 0x2ba   :  { %873 = vmatmul.msk.bf16.vlgmr.msrb.gmra.mxu1 %vm255_vm1, %v533_v15 }
 0x2cc   :  { %557 = vrot.lane.b32.xlu1 %v1252_v25, %s1151_s17 }
 0x2d4   :  { %671 = vrot.lane.b32.xlu1 %v1244_v16, %s1152_s1 }
 0x2dc   :  { %694 = vrot.lane.b32.xlu1 %v1252_v25, %s1152_s1 }
 0x2e4   :  { %692 = vrot.lane.b32.xlu1 %v1259_v27, %s1152_s1 }
 0x2e7   :  { %v311_v38 = vpop.xlane.xlu1 %310 }
 0x2e8   :  { %917 = vrcp.f32 %v311_v38 }
 0x2ee   :  { %v918_v39 = vpop.eup %917 }
 0x2ef   :  { %v315_v40 = vmul.f32 %v918_v39, %v912_v23 }
 0x2f1   :  { %v317_v41 = vpack.c.bf16 %v315_v40, %v315_v40 }
 0x2f3   :  { %866 = vmatmul.msk.bf16.vlgmr.msrb.gmra.mxu2 %vm255_vm1, %v317_v41 }
 0x326   :  { %v434_v42 = vpop.xlane.xlu1 %433 }
 0x327   :  { %919 = vrcp.f32 %v434_v42  ;;  %v461_v43 = vpop.f32.mrf.mxu1 }
 0x32d   :  { %v920_v44 = vpop.eup %919 }
 0x32e   :  { %v438_v45 = vmul.f32 %v920_v44, %v916_v35 }
 0x32f   :  { %v463_v46 = vpop.f32.mrf.mxu1 }
 0x330   :  { %v440_v16 = vpack.c.bf16 %v438_v45, %v438_v45 }
 0x332   :  { %870 = vmatmul.msk.bf16.vlgmr.msra.gmra.mxu2 %vm255_vm1, %v440_v16 }
 0x337   :  { %v551_v25 = vpop.f32.mrf.mxu1 }
 0x338   :  { %v578_v47 = vsel %vm255_vm1, %v551_v25, -inf }
 0x339   :  { %579 = vmax.xlane.f32.xlu2 %v578_v47 }
 0x33e   :  { %v558_v27 = vpop.permute.xlu1 %557 }
 0x33f   :  { %v563_v48 = vsel %vm255_vm1, %v558_v27, 0  ;;  %v553_v49 = vpop.f32.mrf.mxu1  ;;  %v646_v27 = vld [vmem:[#allocation13 + $0x8] sm:$0xf] }
 0x340   :  { %572 = vmatpush.bf16.xpose.msrb.mxu2 %v563_v48  ;;  %v651_v48 = vsel %vm321_vm2, %v646_v27, 0 }
 0x341   :  { %660 = vmatpush.bf16.msra.mxu1 %v651_v48 }
 0x346   :  { %v672_v51 = vpop.permute.xlu1 %671 }
 0x347   :  { %v677_v52 = vsel %vm255_vm1, %v672_v51, 0  ;;  %874 = vmatmul.msk.bf16.vlgmr.msrb.gmra.mxu2 %vm255_vm1, %v556_v50 }
 0x348   :  { %686 = vmatpush.bf16.xpose.msra.mxu2 %v677_v52 }
 0x34e   :  { %v695_v2 = vpop.permute.xlu1 %694 }
 0x34f   :  { %v700_v6 = vsel %vm255_vm1, %v695_v2, 0 }
 0x351   :  { %602 = vrot.lane.b32.xlu2 %v1275_v57, %s1151_s17 }
 0x356   :  { %v693_v31 = vpop.permute.xlu1 %692 }
 0x359   :  { %669 = vrot.lane.b32.xlu2 %v1248_v21, %s1152_s1 }
 0x376   :  { %v353_v55 = vpop.f32.mrf.mxu2 }
 0x377   :  { %v357_v56 = vpack.c.bf16 %v353_v55, %v334_v34 }
 0x379   :  { %872 = vmatmul.msk.bf16.vlgmr.msrb.gmra.mxu0 %vm255_vm1, %v357_v56 }
 0x37e   :  { %v355_v58 = vpop.f32.mrf.mxu2 }
 0x3ac   :  { %v580_v62 = vpop.xlane.xlu2 %579 }
 0x3ad   :  { %v584_v63 = vsub.f32 %v551_v25, %v580_v62 }
 0x3af   :  { %v586_v0 = vmul.f32 1.442695, %v584_v63 }
 0x3b1   :  { %921 = vpow2.f32 %v586_v0 }
 0x3b4   :  { %v603_v1 = vpop.permute.xlu2 %602 }
 0x3b5   :  { %v608_v3 = vsel %vm321_vm2, %v603_v1, 0  ;;  %v485_v4 = vpop.f32.mrf.mxu2 }
 0x3b6   :  { %v489_v5 = vpack.c.bf16 %v485_v4, %v461_v43  ;;  %617 = vmatpush.bf16.msrb.mxu3 %v608_v3 }
 0x3b7   :  { %v922_v21 = vpop.eup %921 }
 0x3b8   :  { %871 = vmatmul.msk.bf16.vlgmr.msra.gmra.mxu3 %vm255_vm1, %v489_v5  ;;  %v590_v7 = vsel %vm255_vm1, %v922_v21, 0.0 }
 0x3b9   :  { %591 = vadd.xlane.f32.xlu0 %v590_v7 }
 0x3ba   :  { %709 = vmatpush.bf16.xpose.msra.mxu3 %v700_v6 }
 0x3bc   :  { %v670_v8 = vpop.permute.xlu2 %669 }
 0x3bd   :  { %v487_v9 = vpop.f32.mrf.mxu2  ;;  %878 = vmatmul.msk.bf16.vlgmr.msra.gmra.mxu2 %vm255_vm1, %v670_v8 }
 0x3ca   :  { %v574_v10 = vpop.f32.mrf.mxu2 }
 0x3cb   :  { %v581_v11 = vsel %vm255_vm1, %v574_v10, -inf }
 0x3cc   :  { %582 = vmax.xlane.f32.xlu2 %v581_v11 }
 0x3cd   :  { %623 = vrot.lane.b32.xlu0 %v1283_v61, %s1151_s17 }
 0x3d2   :  { %v576_v12 = vpop.f32.mrf.mxu2 }
 0x3f6   :  { %v527_v18 = vpop.f32.mrf.mxu0 }
 0x3fe   :  { %v529_v49 = vpop.f32.mrf.mxu0 }
 0x42c   :  { %v592_v13 = vpop.xlane.xlu0 %591 }
 0x42d   :  { %923 = vrcp.f32 %v592_v13 }
 0x433   :  { %v924_v14 = vpop.eup %923 }
 0x434   :  { %v598_v15 = vmul.f32 %v924_v14, %v922_v21 }
 0x436   :  { %v600_v17 = vpack.c.bf16 %v598_v15, %v598_v15  ;;  %v904_v15 = vld [vmem:[%s1378_s7] ss:$0 sm:$0xff] }
 0x438   :  { %875 = vmatmul.msk.bf16.vlgmr.msrb.gmra.mxu3 %vm255_vm1, %v600_v17 }
 0x43b   :  { %v507_v19 = vpop.f32.mrf.mxu3 }
 0x43c   :  { %v1336_v20 = vadd.f32 %v527_v18, %v507_v19 }
 0x43f   :  { %v624_v22 = vpop.permute.xlu0 %623  ;;  %v583_v23 = vpop.xlane.xlu2 %582 }
 0x440   :  { %v629_v24 = vsel %vm321_vm2, %v624_v22, 0  ;;  %v585_v26 = vsub.f32 %v574_v10, %v583_v23  ;;  %v688_v28 = vpop.f32.mrf.mxu2  ;;  %v783_v10 = vld [vmem:[#allocation13 + $0xc] sm:$0xf] }
 0x441   :  { %638 = vmatpush.bf16.msra.mxu0 %v629_v24  ;;  %v715_v29 = vsel %vm255_vm1, %v688_v28, -inf  ;;  %v788_v11 = vsel %vm321_vm2, %v783_v10, 0 }
 0x442   :  { %v588_v30 = vmul.f32 1.442695, %v585_v26  ;;  %716 = vmax.xlane.f32.xlu0 %v715_v29  ;;  %797 = vmatpush.bf16.msrb.mxu2 %v788_v11 }
 0x443   :  { %v1342_v35 = vpop.f32.mrf.mxu3 }
 0x444   :  { %925 = vpow2.f32 %v588_v30 }
 0x448   :  { %v690_v32 = vpop.f32.mrf.mxu2  ;;  %879 = vmatmul.msk.bf16.vlgmr.msra.gmra.mxu3 %vm255_vm1, %v693_v31 }
 0x44a   :  { %v926_v33 = vpop.eup %925 }
 0x44b   :  { %v593_v34 = vsel %vm255_vm1, %v926_v33, 0.0 }
 0x44c   :  { %594 = vadd.xlane.f32.xlu1 %v593_v34 }
 0x4b5   :  { %v717_v36 = vpop.xlane.xlu0 %716 }
 0x4b6   :  { %v721_v37 = vsub.f32 %v688_v28, %v717_v36 }
 0x4b8   :  { %v723_v38 = vmul.f32 1.442695, %v721_v37 }
 0x4ba   :  { %927 = vpow2.f32 %v723_v38 }
 0x4bb   :  { %v619_v39 = vpop.f32.mrf.mxu3 }
 0x4bf   :  { %v595_v40 = vpop.xlane.xlu1 %594 }
 0x4c0   :  { %v928_v41 = vpop.eup %927  ;;  %929 = vrcp.f32 %v595_v40 }
 0x4c1   :  { %v727_v42 = vsel %vm255_vm1, %v928_v41, 0.0 }
 0x4c2   :  { %728 = vadd.xlane.f32.xlu1 %v727_v42 }
 0x4c3   :  { %v621_v43 = vpop.f32.mrf.mxu3 }
 0x4c6   :  { %v930_v44 = vpop.eup %929 }
 0x4c7   :  { %v599_v45 = vmul.f32 %v930_v44, %v926_v33 }
 0x4c9   :  { %v601_v46 = vpack.c.bf16 %v599_v45, %v599_v45 }
 0x4cb   :  { %876 = vmatmul.msk.bf16.vlgmr.msra.gmra.mxu0 %vm255_vm1, %v601_v46  ;;  %v711_v16 = vpop.f32.mrf.mxu3 }
 0x4cc   :  { %v718_v25 = vsel %vm255_vm1, %v711_v16, -inf }
 0x4cd   :  { %719 = vmax.xlane.f32.xlu2 %v718_v25 }
 0x4d3   :  { %v713_v47 = vpop.f32.mrf.mxu3 }
 0x4db   :  { %739 = vrot.lane.b32.xlu1 %v1275_v57, %s1152_s1 }
 0x535   :  { %v729_v50 = vpop.xlane.xlu1 %728 }
 0x536   :  { %931 = vrcp.f32 %v729_v50 }
 0x53c   :  { %v932_v55 = vpop.eup %931 }
 0x53d   :  { %v735_v59 = vmul.f32 %v932_v55, %v928_v41 }
 0x53f   :  { %v737_v63 = vpack.c.bf16 %v735_v59, %v735_v59 }
 0x540   :  { %v720_v51 = vpop.xlane.xlu2 %719 }
 0x541   :  { %v722_v52 = vsub.f32 %v711_v16, %v720_v51 }
 0x543   :  { %v725_v53 = vmul.f32 1.442695, %v722_v52 }
 0x545   :  { %933 = vpow2.f32 %v725_v53 }
 0x548   :  { %v640_v54 = vpop.f32.mrf.mxu0 }
 0x549   :  { %v644_v56 = vpack.c.bf16 %v640_v54, %v619_v39 }
 0x54b   :  { %v934_v58 = vpop.eup %933  ;;  %877 = vmatmul.msk.bf16.vlgmr.msra.gmra.mxu1 %vm255_vm1, %v644_v56 }
 0x54c   :  { %v730_v57 = vsel %vm255_vm1, %v934_v58, 0.0 }
 0x54d   :  { %731 = vadd.xlane.f32.xlu2 %v730_v57  ;;  %v740_v60 = vpop.permute.xlu1 %739 }
 0x54e   :  { %v745_v62 = vsel %vm321_vm2, %v740_v60, 0 }
 0x54f   :  { %754 = vmatpush.bf16.msrb.mxu0 %v745_v62 }
 0x550   :  { %v642_v0 = vpop.f32.mrf.mxu0 }
 0x552   :  { %880 = vmatmul.msk.bf16.vlgmr.msrb.gmra.mxu0 %vm255_vm1, %v737_v63 }
 0x565   :  { %760 = vrot.lane.b32.xlu2 %v1283_v61, %s1152_s1 }
 0x5c0   :  { %v732_v1 = vpop.xlane.xlu2 %731 }
 0x5c1   :  { %935 = vrcp.f32 %v732_v1 }
 0x5c7   :  { %v936_v2 = vpop.eup %935 }
 0x5c8   :  { %v736_v3 = vmul.f32 %v936_v2, %v934_v58  ;;  %v761_v4 = vpop.permute.xlu2 %760  ;;  %v662_v5 = vpop.f32.mrf.mxu1 }
 0x5c9   :  { %v766_v21 = vsel %vm321_vm2, %v761_v4, 0  ;;  %v667_v6 = vadd.f32 %v662_v5, %v1336_v20  ;;  %v530_v20 = vadd.f32 %v529_v49, %v1342_v35 }
 0x5ca   :  { %v738_v7 = vpack.c.bf16 %v736_v3, %v736_v3  ;;  %775 = vmatpush.bf16.msrb.mxu1 %v766_v21 }
 0x5cd   :  { %881 = vmatmul.msk.bf16.vlgmr.msrb.gmra.mxu1 %vm255_vm1, %v738_v7 }
 0x5cf   :  { %v756_v8 = vpop.f32.mrf.mxu0 }
 0x5d0   :  { %v664_v61 = vpop.f32.mrf.mxu1 }
 0x5d1   :  { %v668_v22 = vadd.f32 %v664_v61, %v530_v20 }
 0x5d7   :  { %v758_v9 = vpop.f32.mrf.mxu0 }
 0x64a   :  { %v777_v12 = vpop.f32.mrf.mxu1 }
 0x64b   :  { %v781_v13 = vpack.c.bf16 %v777_v12, %v756_v8 }
 0x64d   :  { %882 = vmatmul.msk.bf16.vlgmr.msrb.gmra.mxu2 %vm255_vm1, %v781_v13 }
 0x652   :  { %v779_v14 = vpop.f32.mrf.mxu1 }
 0x6d0   :  { %v799_v17 = vpop.f32.mrf.mxu2 }
 0x6d1   :  { %v804_v18 = vadd.f32 %v799_v17, %v667_v6 }
 0x6d3   :  { %v810_v19 = vadd.f32 %v904_v15, %v804_v18 }
 0x6d5   :  { %812 = vst [vmem:[#allocation14] sm:$0xff] %v810_v19 }
 0x6d8   :  { %v801_v23 = vpop.f32.mrf.mxu2 }
 0x6d9   :  { %v805_v24 = vadd.f32 %v801_v23, %v668_v22 }
 0x6db   :  { %v811_v26 = vadd.f32 %v904_v15, %v805_v24 }
 0x6dd   :  { %813 = vst [vmem:[#allocation14 + $0x8] sm:$0xff] %v811_v26 }
 0x6de   :  { %826 = dma.vmem_to_hbm [thread:$0]  %s819_s21, 256, %s821_s24, [#allocation4], %s1140_s13, %s1140_s13, %s1141_s14  }
 0x6df   :  { %1137 = dma.done.wait [#allocation4], 256  }
 0x6e0   :  { %1138 = vsyncadd [#allocation4], 4294967040 }
 0x6e1   :  { %831 = vsyncpa [#allocation3], 1 }
 0x6e2   :  { %832 = vsyncpa [#allocation6], 1 }
 0x6e3   :  { %833 = vsyncpa [#allocation9], 1 }
 0x6e4   :  { %834 = vsyncpa [#allocation12], 1 }
 0x6e5   :  { %835 = vsyncpa [#allocation4], 1 }

</bundles_post_ra>
